<compile_context>
chip_gen: v5e
topology: v5e:2x2
jax: 0.10.0
libtpu: 0.0.40
codegen_flags: <defaults>
</compile_context>

<pallas_src>
import functools

import jax
import jax.numpy as jnp
from jax.experimental import pallas as pl
from jax.experimental.pallas import tpu as pltpu


H1, H2 = 2000, 5000          # hidden sizes from the PyTorch module
H1P, H2P = 2048, 5120        # padded to multiples of 128


def _round_up(x, m):
    return (x + m - 1) // m * m


def _vmem_capacity_bytes():
    """Physical per-core VMEM; conservative 64 MiB (v7x) fallback."""
    try:
        info = pltpu.get_tpu_info()
        cap = int(getattr(info, "vmem_capacity_bytes", 0) or 0)
        if cap > 0:
            return cap
    except Exception:
        pass
    return 64 * 1024 * 1024


_VMEM_CAP = _vmem_capacity_bytes()
_BIG_VMEM = _VMEM_CAP >= 100 * 1024 * 1024            # v5e / v6e (128 MiB)
_ENC_TN_CAP = 2560 if _BIG_VMEM else 1280             # fc21/fc22 column-tile cap
_LIN_TN_CAP = 2048 if _BIG_VMEM else 1024             # fc1 column-tile cap
_DEC_TN_CAP = 1024                                    # fused fc3/fc4 tile (all gens)
# Raise the small scoped defaults; with int8 streaming the peak resident VMEM
# is ~22 MiB (v7x tiles) / ~42 MiB (v6e tiles), well inside these limits.
_VMEM_LIMIT = int(min(max(_VMEM_CAP - 16 * 1024 * 1024, 32 * 1024 * 1024),
                      96 * 1024 * 1024))


def _choose_tn(n, cap):
    """Largest multiple of 128 that divides n and is <= cap."""
    best = min(n, 128)
    t = 128
    while t <= min(n, cap):
        if n % t == 0:
            best = t
        t += 128
    return best


def _dequant(w_i8):
    """int8 weight tile -> bf16 MXU operand (per-column scale applied later)."""
    return w_i8.astype(jnp.bfloat16)


# ----------------------------------------------------------------------------
# Quantized linear (+bias, optional ReLU):  y = relu?((x @ Wq) * s + b)
# Full-K matmul per grid step; grid = (N // tn,) over pre-tiled weight slabs.
# ----------------------------------------------------------------------------
def _linear_kernel(x_ref, w_ref, s_ref, b_ref, o_ref, *, relu):
    w = _dequant(w_ref[0])                                       # (K, tn) bf16
    y = jnp.dot(x_ref[...], w, preferred_element_type=jnp.float32)
    y = y * s_ref[...] + b_ref[...]
    if relu:
        y = jnp.maximum(y, 0.0)
    o_ref[...] = y.astype(o_ref.dtype)


def pallas_linear_q(x, w_t, s, b, *, relu=False, out_dtype=jnp.float32):
    """x: (B,K) bf16; w_t: (nt,K,tn) int8 pre-tiled; s, b: (1, nt*tn) f32."""
    B, K = x.shape
    nt, Kw, tn = w_t.shape
    assert K == Kw, (K, Kw)
    N = nt * tn
    return pl.pallas_call(
        functools.partial(_linear_kernel, relu=relu),
        out_shape=jax.ShapeDtypeStruct((B, N), out_dtype),
        grid=(nt,),
        in_specs=[
            pl.BlockSpec((B, K), lambda n: (0, 0)),         # activations (resident)
            pl.BlockSpec((1, K, tn), lambda n: (n, 0, 0)),  # contiguous weight slab
            pl.BlockSpec((1, tn), lambda n: (0, n)),        # per-column scale
            pl.BlockSpec((1, tn), lambda n: (0, n)),        # bias
        ],
        out_specs=pl.BlockSpec((B, tn), lambda n: (0, n)),
        compiler_params=pltpu.CompilerParams(
            dimension_semantics=("parallel",),
            vmem_limit_bytes=_VMEM_LIMIT,
        ),
    )(x, w_t, s, b)


# ----------------------------------------------------------------------------
# Fused fc21 + fc22 + reparameterize:
#   mu     = (h1 @ W21q) * s21 + b21
#   logvar = (h1 @ W22q) * s22 + b22
#   z      = mu + eps * exp(0.5 * logvar)
# ----------------------------------------------------------------------------
def _encode_reparam_kernel(h1_ref, w21_ref, w22_ref, s21_ref, s22_ref,
                           b21_ref, b22_ref, eps_ref,
                           mu_ref, lv_ref, z_ref):
    h1 = h1_ref[...]
    mu = (jnp.dot(h1, _dequant(w21_ref[0]), preferred_element_type=jnp.float32)
          * s21_ref[...] + b21_ref[...])
    lv = (jnp.dot(h1, _dequant(w22_ref[0]), preferred_element_type=jnp.float32)
          * s22_ref[...] + b22_ref[...])
    mu_ref[...] = mu
    lv_ref[...] = lv
    z_ref[...] = (mu + eps_ref[...] * jnp.exp(0.5 * lv)).astype(z_ref.dtype)


def pallas_encode_reparam(h1, w21_t, w22_t, s21, s22, b21, b22, eps):
    B, K = h1.shape
    nt, Kw, tn = w21_t.shape
    assert K == Kw and w22_t.shape == w21_t.shape
    N = nt * tn
    out_block = pl.BlockSpec((B, tn), lambda n: (0, n))
    return pl.pallas_call(
        _encode_reparam_kernel,
        out_shape=(
            jax.ShapeDtypeStruct((B, N), jnp.float32),   # mu
            jax.ShapeDtypeStruct((B, N), jnp.float32),   # logvar
            jax.ShapeDtypeStruct((B, N), jnp.bfloat16),  # z (feeds the decoder)
        ),
        grid=(nt,),
        in_specs=[
            pl.BlockSpec((B, K), lambda n: (0, 0)),         # h1 (resident)
            pl.BlockSpec((1, K, tn), lambda n: (n, 0, 0)),  # W21 slab
            pl.BlockSpec((1, K, tn), lambda n: (n, 0, 0)),  # W22 slab
            pl.BlockSpec((1, tn), lambda n: (0, n)),        # s21
            pl.BlockSpec((1, tn), lambda n: (0, n)),        # s22
            pl.BlockSpec((1, tn), lambda n: (0, n)),        # b21
            pl.BlockSpec((1, tn), lambda n: (0, n)),        # b22
            pl.BlockSpec((B, tn), lambda n: (0, n)),        # eps
        ],
        out_specs=(out_block, out_block, out_block),
        compiler_params=pltpu.CompilerParams(
            dimension_semantics=("parallel",),
            vmem_limit_bytes=_VMEM_LIMIT,
        ),
    )(h1, w21_t, w22_t, s21, s22, b21, b22, eps)


# ----------------------------------------------------------------------------
# Fused decode (fc3 + ReLU + fc4):
#   per grid step n (a slab of fc3's output columns):
#     h3_n   = relu((z @ W3q[:, n]) * s3_n + b3_n)
#     acc   += h3_n @ W4q[n-rows, :]
#   epilogue: recon = acc * s4 + b4
# The grid axis is a reduction into the recon accumulator -> "arbitrary".
# ----------------------------------------------------------------------------
def _decode_kernel(z_ref, w3_ref, s3_ref, b3_ref, w4_ref, s4_ref, b4_ref,
                   recon_ref, acc_ref):
    n = pl.program_id(0)

    @pl.when(n == 0)
    def _():
        acc_ref[...] = jnp.zeros_like(acc_ref)

    h3 = jnp.dot(z_ref[...], _dequant(w3_ref[0]),
                 preferred_element_type=jnp.float32)
    h3 = jnp.maximum(h3 * s3_ref[...] + b3_ref[...], 0.0)        # (B, tn3) f32
    acc_ref[...] += jnp.dot(h3.astype(jnp.bfloat16), _dequant(w4_ref[...]),
                            preferred_element_type=jnp.float32)

    @pl.when(n == pl.num_programs(0) - 1)
    def _():
        recon_ref[...] = acc_ref[...] * s4_ref[...] + b4_ref[...]


def pallas_decode(z, w3_t, s3, b3, w4, s4, b4):
    """recon = relu(z @ W3 + b3) @ W4 + b4, with int8 weights + per-col scales."""
    B, K3 = z.shape
    nt3, K3w, tn3 = w3_t.shape
    assert K3 == K3w
    Np = w4.shape[1]
    assert w4.shape[0] == nt3 * tn3
    return pl.pallas_call(
        _decode_kernel,
        out_shape=jax.ShapeDtypeStruct((B, Np), jnp.float32),
        grid=(nt3,),
        in_specs=[
            pl.BlockSpec((B, K3), lambda n: (0, 0)),          # z (resident)
            pl.BlockSpec((1, K3, tn3), lambda n: (n, 0, 0)),  # W3 column slab
            pl.BlockSpec((1, tn3), lambda n: (0, n)),         # s3
            pl.BlockSpec((1, tn3), lambda n: (0, n)),         # b3
            pl.BlockSpec((tn3, Np), lambda n: (n, 0)),        # W4 row slab (contiguous)
            pl.BlockSpec((1, Np), lambda n: (0, 0)),          # s4 (resident)
            pl.BlockSpec((1, Np), lambda n: (0, 0)),          # b4 (resident)
        ],
        out_specs=pl.BlockSpec((B, Np), lambda n: (0, 0)),
        scratch_shapes=[pltpu.VMEM((B, Np), jnp.float32)],
        compiler_params=pltpu.CompilerParams(
            dimension_semantics=("arbitrary",),
            vmem_limit_bytes=_VMEM_LIMIT,
        ),
    )(z, w3_t, s3, b3, w4, s4, b4)


# ----------------------------------------------------------------------------
# Parameter init (PyTorch nn.Linear uniform(-1/sqrt(fan_in), +)), int8 weight
# quantization with per-output-column scales, zero padding, HBM pre-tiling.
# ----------------------------------------------------------------------------
def _init_linear(key, fan_in, fan_out):
    kw, kb = jax.random.split(key)
    bound = 1.0 / jnp.sqrt(jnp.float32(fan_in))
    w = jax.random.uniform(kw, (fan_in, fan_out), jnp.float32, -bound, bound)
    b = jax.random.uniform(kb, (fan_out,), jnp.float32, -bound, bound)
    return w, b


def _quantize_per_col(w):
    """Symmetric int8 weight-only quantization, per-output-column f32 scales."""
    s = jnp.max(jnp.abs(w), axis=0) / 127.0
    s_safe = jnp.where(s > 0, s, 1.0)
    q = jnp.clip(jnp.round(w / s_safe), -127, 127).astype(jnp.int8)
    return q, s.astype(jnp.float32)


def _pad2(a, rows, cols):
    return jnp.pad(a, ((0, rows - a.shape[0]), (0, cols - a.shape[1])))


def _pretile_cols(w, tn):
    """(K, N) -> (N//tn, K, tn): each column slab becomes one contiguous chunk."""
    K, N = w.shape
    assert N % tn == 0, (N, tn)
    return jnp.transpose(w.reshape(K, N // tn, tn), (1, 0, 2))


def make_vae_params(key, size):
    size_p = _round_up(size, 128)
    tn1 = _choose_tn(H1P, _LIN_TN_CAP)   # fc1 output tiles
    tn2 = _choose_tn(H2P, _ENC_TN_CAP)   # fc21 / fc22 output tiles
    tn3 = _choose_tn(H1P, _DEC_TN_CAP)   # fc3 output / fc4 reduction tiles

    ks = jax.random.split(key, 5)
    ref = {}

    def q_layer(name, k, fan_in, fan_out, kp, np_):
        w, b = _init_linear(k, fan_in, fan_out)
        q, s = _quantize_per_col(w)
        ref["w" + name] = q.astype(jnp.float32) * s[None, :]   # dequantized ref
        ref["b" + name] = b
        return (_pad2(q, kp, np_),
                _pad2(s[None, :], 1, np_),
                _pad2(b[None, :], 1, np_))

    q1, s1, b1 = q_layer("1", ks[0], size, H1, size_p, H1P)
    q21, s21, b21 = q_layer("21", ks[1], H1, H2, H1P, H2P)
    q22, s22, b22 = q_layer("22", ks[2], H1, H2, H1P, H2P)
    q3, s3, b3 = q_layer("3", ks[3], H2, H1, H2P, H1P)
    q4, s4, b4 = q_layer("4", ks[4], H1, size, H1P, size_p)

    params = dict(
        w1=_pretile_cols(q1, tn1), s1=s1, b1=b1,
        w21=_pretile_cols(q21, tn2), s21=s21, b21=b21,
        w22=_pretile_cols(q22, tn2), s22=s22, b22=b22,
        w3=_pretile_cols(q3, tn3), s3=s3, b3=b3,
        w4=q4, s4=s4, b4=b4,          # row slabs are already contiguous for fc4
        size_p=size_p,
    )
    return params, ref


# ----------------------------------------------------------------------------
# VAE forward (Pallas hot path): 3 pallas_calls.
# ----------------------------------------------------------------------------
def vae_forward(x, params, eps):
    """x: (B, size) f32, eps: (B, H2P) f32 with zero padding columns.
       Returns (recon, mu, logvar) with the original (unpadded) shapes."""
    B, size = x.shape
    size_p = params["size_p"]
    x_p = jnp.pad(x, ((0, 0), (0, size_p - size))).astype(jnp.bfloat16)

    h1 = pallas_linear_q(x_p, params["w1"], params["s1"], params["b1"],
                         relu=True, out_dtype=jnp.bfloat16)              # (B, 2048)
    mu_p, logvar_p, z = pallas_encode_reparam(
        h1, params["w21"], params["w22"], params["s21"], params["s22"],
        params["b21"], params["b22"], eps)                               # (B, 5120)
    recon_p = pallas_decode(z, params["w3"], params["s3"], params["b3"],
                            params["w4"], params["s4"], params["b4"])    # (B, size_p)
    return recon_p[:, :size], mu_p[:, :H2], logvar_p[:, :H2]

# TODO(synk): next tier: a single whole-forward pallas_call (h1/z/h3 stay
# resident in VMEM, <40 KB at B=2) via pltpu.emit_pipeline, or cross-call
# weight-prefetch futures (P10) to hide each layer's first-tile weight DMA.


def vae_forward_ref(x, ref, eps):
    """Pure-JAX reference modelling the kernel exactly: int8-dequantized
    weights and bf16 activation casts between layers."""
    bf = lambda a: a.astype(jnp.bfloat16).astype(jnp.float32)
    xq = bf(x)
    h1 = bf(jnp.maximum(xq @ ref["w1"] + ref["b1"], 0.0))
    mu = h1 @ ref["w21"] + ref["b21"]
    logvar = h1 @ ref["w22"] + ref["b22"]
    z = bf(mu + eps[:, :H2] * jnp.exp(0.5 * logvar))
    h3 = bf(jnp.maximum(z @ ref["w3"] + ref["b3"], 0.0))
    recon = h3 @ ref["w4"] + ref["b4"]
    return recon, mu, logvar


if __name__ == "__main__":
    SIZE = 256   # "size" arg of VAE.__init__ (input/output feature dim)
    B = 2

    key = jax.random.PRNGKey(0)
    kp, kx, ke = jax.random.split(key, 3)
    params, ref = make_vae_params(kp, SIZE)

    # forward does x.view(-1, size); we supply it already flattened.
    x = jax.random.normal(kx, (B, SIZE), jnp.float32)
    # eps = randn_like(std), generated for the H2 real columns and ZERO-padded
    # so z's padded lanes are exactly 0 (no eps leaks into the padding).
    eps = jax.random.normal(ke, (B, H2), jnp.float32)
    eps_p = jnp.pad(eps, ((0, 0), (0, H2P - H2)))

    recon, mu, logvar = vae_forward(x, params, eps_p)
    jax.block_until_ready((recon, mu, logvar))

    r_recon, r_mu, r_logvar = vae_forward_ref(x, ref, eps_p)
    assert recon.shape == (B, SIZE) and mu.shape == (B, H2) and logvar.shape == (B, H2)
    assert jnp.allclose(mu, r_mu, atol=1e-2, rtol=1e-2)
    assert jnp.allclose(logvar, r_logvar, atol=1e-2, rtol=1e-2)
    assert jnp.allclose(recon, r_recon, atol=3e-2, rtol=3e-2)

    print("KERNEL_OK")
</pallas_src>

<mosaic_0001>
module attributes {stable_mosaic.version = 11 : i64} {
  func.func @_linear_kernel(%arg0: i32, %arg1: memref<2x256xbf16, #tpu.memory_space<vmem>>, %arg2: memref<1x256x1024xi8, #tpu.memory_space<vmem>>, %arg3: memref<1x1024xf32, #tpu.memory_space<vmem>>, %arg4: memref<1x1024xf32, #tpu.memory_space<vmem>>, %arg5: memref<2x1024xbf16, #tpu.memory_space<vmem>>) attributes {dimension_semantics = [#tpu.dimension_semantics<parallel>], iteration_bounds = array<i64: 2>, scalar_prefetch = 0 : i64, scratch_operands = 0 : i64, tpu.core_type = #tpu.core_type<tc>, window_params = [{pipeline_mode = #tpu.pipeline_mode<synchronous>, transform_indices = @transform_0, window_bounds = array<i64: 2, 256>}, {transform_indices = @transform_1, window_bounds = array<i64: 1, 256, 1024>}, {transform_indices = @transform_2, window_bounds = array<i64: 1, 1024>}, {transform_indices = @transform_3, window_bounds = array<i64: 1, 1024>}, {transform_indices = @transform_4, window_bounds = array<i64: 2, 1024>}]} {
    %c0 = arith.constant 0 : index
    %c0_0 = arith.constant 0 : index
    %c0_1 = arith.constant 0 : index
    %0 = vector.load %arg2[%c0, %c0_0, %c0_1] : memref<1x256x1024xi8, #tpu.memory_space<vmem>>, vector<1x256x1024xi8>
    %1 = vector.shape_cast %0 : vector<1x256x1024xi8> to vector<256x1024xi8>
    %2 = arith.sitofp %1 : vector<256x1024xi8> to vector<256x1024xbf16>
    %c0_2 = arith.constant 0 : index
    %c0_3 = arith.constant 0 : index
    %3 = vector.load %arg1[%c0_2, %c0_3] : memref<2x256xbf16, #tpu.memory_space<vmem>>, vector<2x256xbf16>
    %cst = arith.constant dense<0.000000e+00> : vector<2x1024xf32>
    %4 = tpu.matmul %3, %2, %cst {dimension_numbers = #tpu.dot_dimension_numbers<[1], [0], [0], [1], [0, 0, 1, 1], [], []>} : vector<2x256xbf16>, vector<256x1024xbf16>, vector<2x1024xf32> -> vector<2x1024xf32>
    %c0_4 = arith.constant 0 : index
    %c0_5 = arith.constant 0 : index
    %5 = vector.load %arg3[%c0_4, %c0_5] : memref<1x1024xf32, #tpu.memory_space<vmem>>, vector<1x1024xf32>
    %6 = vector.broadcast %5 : vector<1x1024xf32> to vector<2x1024xf32>
    %7 = arith.mulf %4, %6 : vector<2x1024xf32>
    %c0_6 = arith.constant 0 : index
    %c0_7 = arith.constant 0 : index
    %8 = vector.load %arg4[%c0_6, %c0_7] : memref<1x1024xf32, #tpu.memory_space<vmem>>, vector<1x1024xf32>
    %9 = vector.broadcast %8 : vector<1x1024xf32> to vector<2x1024xf32>
    %10 = arith.addf %7, %9 : vector<2x1024xf32>
    %cst_8 = arith.constant 0.000000e+00 : f32
    %11 = vector.broadcast %cst_8 : f32 to vector<2x1024xf32>
    %12 = arith.maximumf %10, %11 : vector<2x1024xf32>
    %13 = arith.truncf %12 : vector<2x1024xf32> to vector<2x1024xbf16>
    %c0_9 = arith.constant 0 : index
    %c0_10 = arith.constant 0 : index
    %14 = vector.load %arg5[%c0_9, %c0_10] : memref<2x1024xbf16, #tpu.memory_space<vmem>>, vector<2x1024xbf16>
    tpu.vector_store %arg5[%c0_9, %c0_10], %13 {strides = array<i32>} : memref<2x1024xbf16, #tpu.memory_space<vmem>>, vector<2x1024xbf16>,
    return
  }
  func.func @transform_0(%arg0: i32) -> (i32, i32) {
    %c0_i32 = arith.constant 0 : i32
    %c0_i32_0 = arith.constant 0 : i32
    %c0_i32_1 = arith.constant 0 : i32
    return %c0_i32, %c0_i32_0 : i32, i32
  }
  func.func @transform_1(%arg0: i32) -> (i32, i32, i32) {
    %c0_i32 = arith.constant 0 : i32
    %c0_i32_0 = arith.constant 0 : i32
    %c0_i32_1 = arith.constant 0 : i32
    return %arg0, %c0_i32, %c0_i32_0 : i32, i32, i32
  }
  func.func @transform_2(%arg0: i32) -> (i32, i32) {
    %c0_i32 = arith.constant 0 : i32
    %c0_i32_0 = arith.constant 0 : i32
    return %c0_i32, %arg0 : i32, i32
  }
  func.func @transform_3(%arg0: i32) -> (i32, i32) {
    %c0_i32 = arith.constant 0 : i32
    %c0_i32_0 = arith.constant 0 : i32
    return %c0_i32, %arg0 : i32, i32
  }
  func.func @transform_4(%arg0: i32) -> (i32, i32) {
    %c0_i32 = arith.constant 0 : i32
    %c0_i32_0 = arith.constant 0 : i32
    return %c0_i32, %arg0 : i32, i32
  }
}

</mosaic_0001>

<bundles_post_ra>
// kernel: tpu_custom_call.1
= control target key start
LH: loop header
LB: loop body
LE: loop exit
PB: predicated region body
PF: predicated region fallthrough
CT: control target
= control target key end

     0   :  { %s2090_s0 = inlined_call_operand.hbm [shape: bf16[2,256], index: 0, kind: input, shape index: {}]   ;;  %s2091_s1 = inlined_call_operand.hbm [shape: s8[2,256,1024], index: 1, kind: input, shape index: {}]   ;;  %s2092_s2 = inlined_call_operand.hbm [shape: f32[1,2048], index: 2, kind: input, shape index: {}]   ;;  %s2093_s3 = inlined_call_operand.hbm [shape: f32[1,2048], index: 3, kind: input, shape index: {}]   ;;  %s2094_s4 = inlined_call_operand.hbm [shape: bf16[2,2048], index: 4, kind: output, shape index: {}]  }
   0x1   :  { %2095 = sst [smem:[#allocation16_spill]] %s2090_s0 }
   0x2   :  { %2096 = sst [smem:[#allocation17_spill]] %s2091_s1 }
   0x3   :  { %9 = vsyncpa [#allocation3], 0 }
   0x4   :  { %10 = vsyncpa [#allocation6], 0 }
   0x5   :  { %12 = vsyncpa [#allocation6 + $0x1], 0 }
   0x6   :  { %13 = vsyncpa [#allocation9], 0 }
   0x7   :  { %15 = vsyncpa [#allocation9 + $0x1], 0 }
   0x8   :  { %16 = vsyncpa [#allocation4], 0 }
   0x9   :  { %18 = vsyncpa [#allocation4 + $0x1], 0  ;;  %s1787_s15 = smov 0   ;;  %s1789_s16 = smov 0  }
   0xa   :  { %s1791_s17 = smov 0   ;;  %s1793_s18 = smov 0  }
   0xb LB: > { %s1808_s19 = sadd.s32 1, %s1757_s18   ;;  %s52_s20 = sadd.s32 1, %s1753_s17  ;;  %s1757_s18 = sphi %s1793_s18, %s2110_s18   ;;  %s1753_s17 = sphi %s1791_s17, %s2109_s17   ;;  %s1749_s16 = sphi %s1789_s16, %s2108_s16   ;;  %s1745_s15 = sphi %s1787_s15, %s2107_s15  }
   0xc   : > { %s49_s21 = ssub.s32 %s1757_s18, %s1808_s19  ;;  %p59_p0 = scmp.ne.s32.totalorder %s1753_s17, %s1749_s16 }
   0xd   : > { %p50_p1 = scmp.eq.s32.totalorder %s49_s21, 0  ;;  %p60_p2 = scmp.eq.s32.totalorder %s1757_s18, 0 }
   0xe   : > { %p1523_p4 = scmp.lt.s32.totalorder %s1757_s18, 2  ;;  %s179_s23 = sand.u32 1, %s1757_s18  }
   0xf   : > { %s1819_s22 = scalar_select %p50_p1, %s1753_s17, %s52_s20  }
  0x10   : > { %p61_p5 = por %p60_p2, %p59_p0  ;;  %s1826_s24 = sand.u32 1, %s1753_s17  }
  0x11   : > { %2097 = sst [smem:[#allocation15_spill]] %s1819_s22  ;;  %s1474_s25 = sshll.u32 %s1826_s24, 9 }
  0x12   : > { %s1491_s26 = sshll.u32 %s1757_s18, 9  ;;  %s2098_s1 = sld [smem:[#allocation17_spill]] }
  0x13   : > { %s183_s5 = scalar_lea.vmem [#allocation5], %s1474_s25  ;;  %p1835_p6 = pnand %p1523_p4, %p61_p5 }
  0x14   : > { %s191_s6 = sshll.u32 %s183_s5, 4  ;;  %s1839_s8 = scalar_lea.sflag [#allocation6], %s179_s23  ;;  %s192_s6 = int_to_ptr.vmem [resolvable:$true] %s191_s6 }
  0x15   : > { %p1567_p8 = pneg %p1835_p6 }
  0x18   : > { %s188_s29 = scalar_lea.hbm %s2098_s1, %s1491_s26  ;;  %s1570_s13 = scalar_lea.hbm %s2098_s1, 1024 }
  0x19   : > { %s189_s30 = sshll.u32 %s188_s29, 4  ;;  %s190_s30 = int_to_ptr.hbm [resolvable:$true] %s189_s30 }
  0x1a   : > { %s1563_s9 = sshra.s32 %s190_s30, 4  ;;  %s1564_s9 = int_to_ptr.hbm [resolvable:$true] %s1563_s9 }
  0x1b   : > { %s1565_s10 = scalar_lea.hbm %s1564_s9, 512  ;;  %p1571_p11 = scmp.lt.s32.totalorder %s1564_s9, %s2098_s1 }
  0x1c   : > { %p1566_p7 = scmp.ne.s32.totalorder %s1564_s9, %s1565_s10  ;;  %p1572_p12 = scmp.lt.s32.totalorder %s1570_s13, %s1565_s10 }
  0x1e   : > { %p1568_p9 = pnand %p1567_p8, %p1566_p7  ;;  %p1573_p13 = por %p1572_p12, %p1571_p11 }
  0x20   : > { %p1569_p10 = pneg %p1568_p9 }
  0x22   : > { %p1574_p1 = pnand %p1573_p13, %p1569_p10 }
  0x24   : > { %1577 = shalt.err (!%p1574_p1)
}
  0x25   : > { %s1759_s21 = smov 1024   ;;  %s1760_s23 = smov 64  }
  0x26   : > { %1511 = dma.hbm_to_vmem [thread:$0]  (!%p1835_p6), %s190_s30, 8192, %s192_s6, %s1839_s8, %s1759_s21, %s1759_s21, %s1760_s23  }
  0x27   : > { %s1856_s25 = sadd.s32 4294967295, %s1757_s18   ;;  %s1470_s26 = sadd.s32 4294967294, %s1757_s18  }
  0x28   : > { %p65_p2 = scmp.ne.s32.totalorder %s1749_s16, %s1745_s15  ;;  %p66_p4 = scmp.eq.s32.totalorder %s1856_s25, 0 }
  0x29   : > { %p141_p5 = scmp.eq.s32.totalorder %s1856_s25, 1  ;;  %p147_p7 = scmp.eq.s32.totalorder %s1470_s26, 1 }
  0x2a   : > { %p1865_p9 = por %p66_p4, %p65_p2  ;;  %p1471_p10 = scmp.ge.s32.totalorder %s1757_s18, 1 }
  0x2b   : > { %p1873_p11 = por %p141_p5, %p59_p0  ;;  %p1877_p12 = por %p147_p7, %p65_p2 }
  0x2c   : > { %p154_p13 = scmp.lt.s32.totalorder %s1757_s18, 3  ;;  %s2103_s0 = sld [smem:[#allocation16_spill]] }
  0x2d   : > { %s1761_s10 = smov [#allocation2]   ;;  %s1477_s12 = sshll.u32 %s1826_s24, 3 }
  0x2e   : > { %p1885_p1 = pnand %p1471_p10, %p154_p13  ;;  %s168_s11 = sshll.u32 %s1761_s10, 4  ;;  %s169_s11 = int_to_ptr.vmem [resolvable:$true] %s168_s11 }
  0x2f   : > { %s1478_s13 = sshll.u32 %s1757_s18, 3  ;;  %s205_s26 = scalar_lea.vmem [#allocation7], %s1477_s12 }
  0x30   : > { %p1504_p0 = pneg %p1885_p1  ;;  %s209_s21 = scalar_lea.hbm %s2092_s2, %s1478_s13 }
  0x31   : > { %s211_s23 = sshll.u32 %s209_s21, 4  ;;  %s213_s30 = sshll.u32 %s205_s26, 4  ;;  %s212_s23 = int_to_ptr.hbm [resolvable:$true] %s211_s23  ;;  %s214_s30 = int_to_ptr.vmem [resolvable:$true] %s213_s30 }
  0x32   : > { %s166_s6 = sshll.u32 %s2103_s0, 4  ;;  %p1505_p2 = pnand %p1504_p0, %p66_p4  ;;  %s167_s6 = int_to_ptr.hbm [resolvable:$true] %s166_s6 }
  0x33   : > { %s1623_s5 = sshra.s32 %s212_s23, 4  ;;  %s1630_s22 = scalar_lea.hbm %s2092_s2, 16  ;;  %s1624_s5 = int_to_ptr.hbm [resolvable:$true] %s1623_s5 }
  0x34   : > { %1507 = dma.hbm_to_vmem [thread:$0]  (!%p1505_p2), %s167_s6, 32, %s169_s11, [#allocation3]  }
  0x35   : > { %s1625_s10 = scalar_lea.hbm %s1624_s5, 8  ;;  %p1631_p13 = scmp.lt.s32.totalorder %s1624_s5, %s2092_s2 }
  0x36   : > { %p1626_p5 = scmp.ne.s32.totalorder %s1624_s5, %s1625_s10  ;;  %p1632_p0 = scmp.lt.s32.totalorder %s1630_s22, %s1625_s10 }
  0x38   : > { %p1628_p7 = pnand %p1626_p5, %p1567_p8  ;;  %p1633_p3 = por %p1632_p0, %p1631_p13 }
  0x3a   : > { %p1629_p10 = pneg %p1628_p7 }
  0x3c   : > { %p1634_p2 = pnand %p1633_p3, %p1629_p10 }
  0x3e   : > { %1637 = shalt.err (!%p1634_p2)
}
  0x3f   : > { %1514 = dma.hbm_to_vmem [thread:$0]  (!%p1835_p6), %s212_s23, 128, %s214_s30, %s1839_s8  }
  0x40   : > { %s228_s21 = scalar_lea.hbm %s2093_s3, %s1478_s13  ;;  %s224_s1 = scalar_lea.vmem [#allocation8], %s1477_s12 }
  0x41   : > { %s230_s0 = sshll.u32 %s228_s21, 4  ;;  %s232_s26 = sshll.u32 %s224_s1, 4  ;;  %s231_s0 = int_to_ptr.hbm [resolvable:$true] %s230_s0  ;;  %s233_s26 = int_to_ptr.vmem [resolvable:$true] %s232_s26 }
  0x42   : > { %s221_s5 = scalar_lea.sflag [#allocation9], %s1826_s24  ;;  %s1653_s22 = sshra.s32 %s231_s0, 4  ;;  %s1654_s22 = int_to_ptr.hbm [resolvable:$true] %s1653_s22 }
  0x43   : > { %s1655_s10 = scalar_lea.hbm %s1654_s22, 8  ;;  %s1660_s23 = scalar_lea.hbm %s2093_s3, 16 }
  0x44   : > { %p1656_p3 = scmp.ne.s32.totalorder %s1654_s22, %s1655_s10  ;;  %p1661_p10 = scmp.lt.s32.totalorder %s1654_s22, %s2093_s3 }
  0x45   : > { %p1662_p13 = scmp.lt.s32.totalorder %s1660_s23, %s1655_s10 }
  0x46   : > { %p1658_p5 = pnand %p1656_p3, %p1567_p8 }
  0x47   : > { %p1663_p0 = por %p1662_p13, %p1661_p10 }
  0x48   : > { %p1659_p7 = pneg %p1658_p5 }
  0x4a   : > { %p1664_p2 = pnand %p1663_p0, %p1659_p7 }
  0x4c   : > { %1667 = shalt.err (!%p1664_p2)
}
  0x4d   : > { %1517 = dma.hbm_to_vmem [thread:$0]  (!%p1835_p6), %s231_s0, 128, %s233_s26, %s221_s5  }
  0x4e   : > { %241 = sbr.rel (%p1885_p1) target bundleno = 408 (0x198), region = 36 }
  0x53   : > { %1728 = dma.done.wait (%p66_p4), [#allocation3], 32  }
  0x54   : > { %1730 = vsyncadd (%p66_p4), [#allocation3], 4294967264  ;;  %s248_s24 = sand.u32 1, %s1856_s25   ;;  %s1933_s12 = sand.u32 1, %s1749_s16  }
  0x55   : > { %s1483_s20 = sshll.u32 %s1933_s12, 9  ;;  %s249_s6 = scalar_lea.sflag [#allocation6], %s248_s24 }
  0x56   : > { %s1936_s7 = scalar_lea.vmem [#allocation5], %s1483_s20 }
  0x57   : > { %1732 = dma.done.wait (%p1865_p9), %s249_s6, 8320  }
  0x58   : > { %1734 = vsyncadd (%p1865_p9), %s249_s6, 4294958976  ;;  %s1943_s9 = sshll.u32 %s1933_s12, 3  ;;  %s269_s21 = scalar_lea.sflag [#allocation9], %s1933_s12 }
  0x59   : > { %s262_s11 = scalar_lea.vmem [#allocation7], %s1943_s9  ;;  %s272_s0 = scalar_lea.vmem [#allocation8], %s1943_s9 }
  0x5a   : > { %1736 = dma.done.wait (%p1865_p9), %s269_s21, 128  }
  0x5b   : > { %1738 = vsyncadd (%p1865_p9), %s269_s21, 4294967168  ;;  %v335_v0 = vld [vmem:[%s1936_s7 + $0xc0] sm:$0xff]  ;;  %v336_v2 = vld [vmem:[%s1936_s7 + $0xc8] sm:$0xff]  ;;  %vm1305_vm0 = vcmask 1040384   ;;  %vm1309_vm1 = vcmask 1042434   ;;  %vm1313_vm2 = vcmask 1041408  }
  0x5c   : > { %v367_v1 = vld [vmem:[%s1936_s7 + $0x1c0] sm:$0xff]  ;;  %v487_v3 = vunpack.c.2.s8 %v335_v0  ;;  %v495_v4 = vunpack.c.3.s8 %v335_v0  ;;  %v368_v7 = vld [vmem:[%s1936_s7 + $0x1c8] sm:$0xff]  ;;  %v488_v8 = vunpack.c.2.s8 %v336_v2  ;;  %v496_v9 = vunpack.c.3.s8 %v336_v2  ;;  %s1488_s27 = sshll.u32 %s1856_s25, 3  ;;  %s307_s22 = scalar_lea.vmem [#allocation10], %s1943_s9 }
  0x5d   : > { %v615_v5 = vunpack.c.2.s8 %v367_v1  ;;  %v623_v6 = vunpack.c.3.s8 %v367_v1  ;;  %v616_v10 = vunpack.c.2.s8 %v368_v7  ;;  %v624_v11 = vunpack.c.3.s8 %v368_v7  ;;  %v327_v28 = vld [vmem:[%s1936_s7 + $0x80] sm:$0xff]  ;;  %v328_v42 = vld [vmem:[%s1936_s7 + $0x88] sm:$0xff]  ;;  %s1340_s5 = scalar_lea.hbm %s2094_s4, %s1488_s27  ;;  %s1342_s10 = sshll.u32 %s307_s22, 4  ;;  %s1343_s10 = int_to_ptr.vmem [resolvable:$true] %s1342_s10 }
  0x5e   : > { %v743_v12 = vcvt.s32.f32 %v487_v3  ;;  %v751_v13 = vcvt.s32.f32 %v495_v4  ;;  %v744_v16 = vcvt.s32.f32 %v488_v8  ;;  %v752_v17 = vcvt.s32.f32 %v496_v9  ;;  %v359_v37 = vld [vmem:[%s1936_s7 + $0x180] sm:$0xff]  ;;  %v360_v47 = vld [vmem:[%s1936_s7 + $0x188] sm:$0xff]  ;;  %s1344_s25 = sshll.u32 %s1340_s5, 4  ;;  %s1330_s14 = scalar_lea.sflag [#allocation4], %s1933_s12  ;;  %s1345_s25 = int_to_ptr.hbm [resolvable:$true] %s1344_s25 }
  0x5f   : > { %v871_v14 = vcvt.s32.f32 %v615_v5  ;;  %v879_v15 = vcvt.s32.f32 %v623_v6  ;;  %v872_v18 = vcvt.s32.f32 %v616_v10  ;;  %v880_v19 = vcvt.s32.f32 %v624_v11  ;;  %v319_v8 = vld [vmem:[%s1936_s7 + $0x40] sm:$0xff]  ;;  %s1697_s8 = sshra.s32 %s1345_s25, 4  ;;  %s1703_s24 = scalar_lea.hbm %s2094_s4, 16  ;;  %s1698_s8 = int_to_ptr.hbm [resolvable:$true] %s1697_s8 }
  0x60   : > { %v943_v20 = vpack.c.bf16 %v751_v13, %v743_v12  ;;  %v471_v22 = vunpack.c.0.s8 %v335_v0  ;;  %v479_v23 = vunpack.c.1.s8 %v335_v0  ;;  %v944_v24 = vpack.c.bf16 %v752_v17, %v744_v16  ;;  %v351_v17 = vld [vmem:[%s1936_s7 + $0x140] sm:$0xff]  ;;  %s1699_s23 = scalar_lea.hbm %s1698_s8, 8  ;;  %p1704_p9 = scmp.lt.s32.totalorder %s1698_s8, %s2094_s4 }
  0x61   : > { %v1007_v21 = vpack.c.bf16 %v879_v15, %v871_v14  ;;  %v1008_v25 = vpack.c.bf16 %v880_v19, %v872_v18  ;;  %v599_v26 = vunpack.c.0.s8 %v367_v1  ;;  %v607_v27 = vunpack.c.1.s8 %v367_v1  ;;  %p1700_p6 = scmp.ne.s32.totalorder %s1698_s8, %s1699_s23  ;;  %p1705_p1 = scmp.lt.s32.totalorder %s1703_s24, %s1699_s23 }
  0x62   : > { %1022 = vmatpush.bf16.msra.mxu0 %v943_v20  ;;  %v727_v29 = vcvt.s32.f32 %v471_v22  ;;  %v735_v30 = vcvt.s32.f32 %v479_v23  ;;  %v472_v31 = vunpack.c.0.s8 %v336_v2  ;;  %v480_v32 = vunpack.c.1.s8 %v336_v2  ;;  %1048 = vmatpush.bf16.msra.mxu2 %v944_v24  ;;  %v320_v22 = vld [vmem:[%s1936_s7 + $0x48] sm:$0xff] }
  0x63   : > { %1035 = vmatpush.bf16.msra.mxu1 %v1007_v21  ;;  %1061 = vmatpush.bf16.msra.mxu3 %v1008_v25  ;;  %v855_v33 = vcvt.s32.f32 %v599_v26  ;;  %v863_v34 = vcvt.s32.f32 %v607_v27  ;;  %v600_v35 = vunpack.c.0.s8 %v368_v7  ;;  %v608_v36 = vunpack.c.1.s8 %v368_v7  ;;  %v352_v27 = vld [vmem:[%s1936_s7 + $0x148] sm:$0xff]  ;;  %p1701_p8 = pnand %p1700_p6, %p1873_p11  ;;  %p1706_p3 = por %p1705_p1, %p1704_p9 }
  0x64   : > { %v935_v38 = vpack.c.bf16 %v735_v30, %v727_v29  ;;  %v728_v39 = vcvt.s32.f32 %v472_v31  ;;  %v736_v40 = vcvt.s32.f32 %v480_v32  ;;  %v455_v41 = vunpack.c.2.s8 %v327_v28 }
  0x65   : > { %v999_v43 = vpack.c.bf16 %v863_v34, %v855_v33  ;;  %v856_v44 = vcvt.s32.f32 %v600_v35  ;;  %v864_v45 = vcvt.s32.f32 %v608_v36  ;;  %v463_v46 = vunpack.c.3.s8 %v327_v28  ;;  %p1702_p4 = pneg %p1701_p8 }
  0x66   : > { %1023 = vmatpush.bf16.msra.mxu0 %v935_v38  ;;  %v936_v48 = vpack.c.bf16 %v736_v40, %v728_v39  ;;  %v711_v49 = vcvt.s32.f32 %v455_v41  ;;  %v583_v50 = vunpack.c.2.s8 %v359_v37  ;;  %v591_v51 = vunpack.c.3.s8 %v359_v37 }
  0x67   : > { %1036 = vmatpush.bf16.msra.mxu1 %v999_v43  ;;  %v1000_v52 = vpack.c.bf16 %v864_v45, %v856_v44  ;;  %v719_v53 = vcvt.s32.f32 %v463_v46  ;;  %v456_v54 = vunpack.c.2.s8 %v328_v42  ;;  %v464_v55 = vunpack.c.3.s8 %v328_v42  ;;  %p1707_p5 = pnand %p1706_p3, %p1702_p4 }
  0x68   : > { %1049 = vmatpush.bf16.msra.mxu2 %v936_v48  ;;  %v839_v56 = vcvt.s32.f32 %v583_v50  ;;  %v847_v57 = vcvt.s32.f32 %v591_v51  ;;  %v584_v58 = vunpack.c.2.s8 %v360_v47  ;;  %v592_v59 = vunpack.c.3.s8 %v360_v47 }
  0x69   : > { %1062 = vmatpush.bf16.msra.mxu3 %v1000_v52  ;;  %v927_v60 = vpack.c.bf16 %v719_v53, %v711_v49  ;;  %v712_v61 = vcvt.s32.f32 %v456_v54  ;;  %v720_v62 = vcvt.s32.f32 %v464_v55  ;;  %v439_v63 = vunpack.c.0.s8 %v327_v28  ;;  %v311_v52 = vld [vmem:[%s1936_s7] sm:$0xff]  ;;  %v1015_v53 = vld [vmem:[#allocation2] sm:$0x3] }
  0x6a   : > { %v991_v0 = vpack.c.bf16 %v847_v57, %v839_v56  ;;  %v840_v1 = vcvt.s32.f32 %v584_v58  ;;  %v848_v2 = vcvt.s32.f32 %v592_v59  ;;  %v447_v3 = vunpack.c.1.s8 %v327_v28  ;;  %1017 = vst [vmem:[#allocation1] ss:$9 sm:$0xff] %v1015_v53 }
  0x6b   : > { %1024 = vmatpush.bf16.msra.mxu0 %v927_v60  ;;  %v928_v4 = vpack.c.bf16 %v720_v62, %v712_v61  ;;  %v695_v5 = vcvt.s32.f32 %v439_v63  ;;  %v567_v6 = vunpack.c.0.s8 %v359_v37  ;;  %v575_v7 = vunpack.c.1.s8 %v359_v37  ;;  %v343_v62 = vld [vmem:[%s1936_s7 + $0x100] sm:$0xff] }
  0x6c   : > { %1037 = vmatpush.bf16.msra.mxu1 %v991_v0  ;;  %v992_v9 = vpack.c.bf16 %v848_v2, %v840_v1  ;;  %v703_v10 = vcvt.s32.f32 %v447_v3  ;;  %v440_v11 = vunpack.c.0.s8 %v328_v42  ;;  %v448_v12 = vunpack.c.1.s8 %v328_v42  ;;  %v312_v3 = vld [vmem:[%s1936_s7 + $0x8] sm:$0xff] }
  0x6d   : > { %1050 = vmatpush.bf16.msra.mxu2 %v928_v4  ;;  %v823_v13 = vcvt.s32.f32 %v567_v6  ;;  %v831_v14 = vcvt.s32.f32 %v575_v7  ;;  %v568_v15 = vunpack.c.0.s8 %v360_v47  ;;  %v576_v16 = vunpack.c.1.s8 %v360_v47 }
  0x6e   : > { %1063 = vmatpush.bf16.msra.mxu3 %v992_v9  ;;  %v919_v18 = vpack.c.bf16 %v703_v10, %v695_v5  ;;  %v696_v19 = vcvt.s32.f32 %v440_v11  ;;  %v704_v20 = vcvt.s32.f32 %v448_v12  ;;  %v423_v21 = vunpack.c.2.s8 %v319_v8 }
  0x6f   : > { %v983_v23 = vpack.c.bf16 %v831_v14, %v823_v13  ;;  %v824_v24 = vcvt.s32.f32 %v568_v15  ;;  %v832_v25 = vcvt.s32.f32 %v576_v16  ;;  %v431_v26 = vunpack.c.3.s8 %v319_v8 }
  0x70   : > { %1025 = vmatpush.bf16.msra.mxu0 %v919_v18  ;;  %v920_v28 = vpack.c.bf16 %v704_v20, %v696_v19  ;;  %v679_v29 = vcvt.s32.f32 %v423_v21  ;;  %v551_v30 = vunpack.c.2.s8 %v351_v17  ;;  %v559_v31 = vunpack.c.3.s8 %v351_v17 }
  0x71   : > { %1038 = vmatpush.bf16.msra.mxu1 %v983_v23  ;;  %v984_v32 = vpack.c.bf16 %v832_v25, %v824_v24  ;;  %v687_v33 = vcvt.s32.f32 %v431_v26  ;;  %v424_v34 = vunpack.c.2.s8 %v320_v22  ;;  %v432_v35 = vunpack.c.3.s8 %v320_v22 }
  0x72   : > { %1051 = vmatpush.bf16.msra.mxu2 %v920_v28  ;;  %v807_v36 = vcvt.s32.f32 %v551_v30  ;;  %v815_v37 = vcvt.s32.f32 %v559_v31  ;;  %v552_v38 = vunpack.c.2.s8 %v352_v27  ;;  %v560_v39 = vunpack.c.3.s8 %v352_v27 }
  0x73   : > { %1064 = vmatpush.bf16.msra.mxu3 %v984_v32  ;;  %v911_v40 = vpack.c.bf16 %v687_v33, %v679_v29  ;;  %v680_v41 = vcvt.s32.f32 %v424_v34  ;;  %v688_v42 = vcvt.s32.f32 %v432_v35  ;;  %v407_v43 = vunpack.c.0.s8 %v319_v8  ;;  %v337_v33 = vld [vmem:[%s1936_s7 + $0xd0] sm:$0xff] }
  0x74   : > { %v975_v44 = vpack.c.bf16 %v815_v37, %v807_v36  ;;  %v808_v45 = vcvt.s32.f32 %v552_v38  ;;  %v816_v46 = vcvt.s32.f32 %v560_v39  ;;  %v415_v47 = vunpack.c.1.s8 %v319_v8  ;;  %v344_v8 = vld [vmem:[%s1936_s7 + $0x108] sm:$0xff] }
  0x75   : > { %1026 = vmatpush.bf16.msra.mxu0 %v911_v40  ;;  %v912_v48 = vpack.c.bf16 %v688_v42, %v680_v41  ;;  %v663_v49 = vcvt.s32.f32 %v407_v43  ;;  %v535_v50 = vunpack.c.0.s8 %v351_v17  ;;  %v543_v51 = vunpack.c.1.s8 %v351_v17  ;;  %v369_v42 = vld [vmem:[%s1936_s7 + $0x1d0] sm:$0xff] }
  0x76   : > { %1039 = vmatpush.bf16.msra.mxu1 %v975_v44  ;;  %v976_v54 = vpack.c.bf16 %v816_v46, %v808_v45  ;;  %v671_v55 = vcvt.s32.f32 %v415_v47  ;;  %v408_v56 = vunpack.c.0.s8 %v320_v22  ;;  %v416_v57 = vunpack.c.1.s8 %v320_v22  ;;  %v338_v47 = vld [vmem:[%s1936_s7 + $0xd8] sm:$0xff] }
  0x77   : > { %1052 = vmatpush.bf16.msra.mxu2 %v912_v48  ;;  %v791_v58 = vcvt.s32.f32 %v535_v50  ;;  %v799_v59 = vcvt.s32.f32 %v543_v51  ;;  %v536_v60 = vunpack.c.0.s8 %v352_v27  ;;  %v544_v61 = vunpack.c.1.s8 %v352_v27 }
  0x78   : > { %1065 = vmatpush.bf16.msra.mxu3 %v976_v54  ;;  %v903_v63 = vpack.c.bf16 %v671_v55, %v663_v49  ;;  %v664_v0 = vcvt.s32.f32 %v408_v56  ;;  %v672_v1 = vcvt.s32.f32 %v416_v57  ;;  %v391_v2 = vunpack.c.2.s8 %v311_v52 }
  0x79   : > { %v967_v4 = vpack.c.bf16 %v799_v59, %v791_v58  ;;  %v792_v5 = vcvt.s32.f32 %v536_v60  ;;  %v800_v6 = vcvt.s32.f32 %v544_v61  ;;  %v399_v7 = vunpack.c.3.s8 %v311_v52 }
  0x7a   : > { %1027 = vmatpush.bf16.msra.mxu0 %v903_v63  ;;  %v904_v9 = vpack.c.bf16 %v672_v1, %v664_v0  ;;  %v647_v10 = vcvt.s32.f32 %v391_v2  ;;  %v519_v11 = vunpack.c.2.s8 %v343_v62  ;;  %v527_v12 = vunpack.c.3.s8 %v343_v62  ;;  %v1972_v1 = vld [vmem:[#allocation1] sm:$0xff] }
  0x7b   : > { %1040 = vmatpush.bf16.msra.mxu1 %v967_v4  ;;  %v968_v13 = vpack.c.bf16 %v800_v6, %v792_v5  ;;  %v655_v14 = vcvt.s32.f32 %v399_v7  ;;  %v392_v15 = vunpack.c.2.s8 %v312_v3  ;;  %v400_v16 = vunpack.c.3.s8 %v312_v3  ;;  %v1974_v6 = vld [vmem:[#allocation1 + $0x9] sm:$0xff] }
  0x7c   : > { %1053 = vmatpush.bf16.msra.mxu2 %v904_v9  ;;  %v775_v17 = vcvt.s32.f32 %v519_v11  ;;  %v783_v18 = vcvt.s32.f32 %v527_v12  ;;  %v520_v19 = vunpack.c.2.s8 %v344_v8  ;;  %v528_v20 = vunpack.c.3.s8 %v344_v8 }
  0x7d   : > { %1066 = vmatpush.bf16.msra.mxu3 %v968_v13  ;;  %v895_v21 = vpack.c.bf16 %v655_v14, %v647_v10  ;;  %v648_v22 = vcvt.s32.f32 %v392_v15  ;;  %v656_v23 = vcvt.s32.f32 %v400_v16  ;;  %v375_v24 = vunpack.c.0.s8 %v311_v52  ;;  %v329_v15 = vld [vmem:[%s1936_s7 + $0x90] sm:$0xff] }
  0x7e   : > { %v959_v25 = vpack.c.bf16 %v783_v18, %v775_v17  ;;  %v776_v26 = vcvt.s32.f32 %v520_v19  ;;  %v784_v27 = vcvt.s32.f32 %v528_v20  ;;  %v383_v28 = vunpack.c.1.s8 %v311_v52  ;;  %v370_v52 = vld [vmem:[%s1936_s7 + $0x1d8] sm:$0xff] }
  0x7f   : > { %1028 = vmatpush.bf16.msra.mxu0 %v895_v21  ;;  %v896_v29 = vpack.c.bf16 %v656_v23, %v648_v22  ;;  %v631_v30 = vcvt.s32.f32 %v375_v24  ;;  %v503_v31 = vunpack.c.0.s8 %v343_v62  ;;  %v511_v32 = vunpack.c.1.s8 %v343_v62  ;;  %v361_v24 = vld [vmem:[%s1936_s7 + $0x190] sm:$0xff] }
  0x80   : > { %1041 = vmatpush.bf16.msra.mxu1 %v959_v25  ;;  %v960_v34 = vpack.c.bf16 %v784_v27, %v776_v26  ;;  %v639_v35 = vcvt.s32.f32 %v383_v28  ;;  %v376_v36 = vunpack.c.0.s8 %v312_v3  ;;  %v384_v37 = vunpack.c.1.s8 %v312_v3 }
  0x81   : > { %1054 = vmatpush.bf16.msra.mxu2 %v896_v29  ;;  %v759_v38 = vcvt.s32.f32 %v503_v31  ;;  %v767_v39 = vcvt.s32.f32 %v511_v32  ;;  %v504_v40 = vunpack.c.0.s8 %v344_v8  ;;  %v512_v41 = vunpack.c.1.s8 %v344_v8  ;;  %v330_v29 = vld [vmem:[%s1936_s7 + $0x98] sm:$0xff] }
  0x82   : > { %1067 = vmatpush.bf16.msra.mxu3 %v960_v34  ;;  %v887_v43 = vpack.c.bf16 %v639_v35, %v631_v30  ;;  %v632_v44 = vcvt.s32.f32 %v376_v36  ;;  %v640_v45 = vcvt.s32.f32 %v384_v37  ;;  %v489_v46 = vunpack.c.2.s8 %v337_v33  ;;  %v362_v34 = vld [vmem:[%s1936_s7 + $0x198] sm:$0xff] }
  0x83   : > { %v951_v48 = vpack.c.bf16 %v767_v39, %v759_v38  ;;  %v760_v49 = vcvt.s32.f32 %v504_v40  ;;  %v768_v50 = vcvt.s32.f32 %v512_v41  ;;  %v497_v51 = vunpack.c.3.s8 %v337_v33 }
  0x84   : > { %1029 = vmatpush.bf16.msra.mxu0 %v887_v43  ;;  %v888_v53 = vpack.c.bf16 %v640_v45, %v632_v44  ;;  %v745_v54 = vcvt.s32.f32 %v489_v46  ;;  %v617_v55 = vunpack.c.2.s8 %v369_v42  ;;  %v625_v56 = vunpack.c.3.s8 %v369_v42 }
  0x85   : > { %1042 = vmatpush.bf16.msra.mxu1 %v951_v48  ;;  %v952_v57 = vpack.c.bf16 %v768_v50, %v760_v49  ;;  %v753_v58 = vcvt.s32.f32 %v497_v51  ;;  %v490_v59 = vunpack.c.2.s8 %v338_v47  ;;  %v498_v60 = vunpack.c.3.s8 %v338_v47 }
  0x86   : > { %1055 = vmatpush.bf16.msra.mxu2 %v888_v53  ;;  %v873_v61 = vcvt.s32.f32 %v617_v55  ;;  %v881_v62 = vcvt.s32.f32 %v625_v56  ;;  %v618_v63 = vunpack.c.2.s8 %v370_v52  ;;  %v626_v0 = vunpack.c.3.s8 %v370_v52 }
  0x87   : > { %1068 = vmatpush.bf16.msra.mxu3 %v952_v57  ;;  %v945_v2 = vpack.c.bf16 %v753_v58, %v745_v54  ;;  %v746_v3 = vcvt.s32.f32 %v490_v59  ;;  %v754_v4 = vcvt.s32.f32 %v498_v60  ;;  %v473_v5 = vunpack.c.0.s8 %v337_v33  ;;  %1030 = vmatmul.bf16.vlgmr.msra.gmra.mxu0 %v1972_v1  ;;  %v321_v59 = vld [vmem:[%s1936_s7 + $0x50] sm:$0xff] }
  0x88   : > { %v1009_v7 = vpack.c.bf16 %v881_v62, %v873_v61  ;;  %v874_v8 = vcvt.s32.f32 %v618_v63  ;;  %v882_v9 = vcvt.s32.f32 %v626_v0  ;;  %v481_v10 = vunpack.c.1.s8 %v337_v33  ;;  %1043 = vmatmul.bf16.vlgmr.msra.gmra.mxu1 %v1974_v6 }
  0x89   : > { %1074 = vmatpush.bf16.msrb.mxu0 %v945_v2  ;;  %v946_v11 = vpack.c.bf16 %v754_v4, %v746_v3  ;;  %v729_v12 = vcvt.s32.f32 %v473_v5  ;;  %v601_v13 = vunpack.c.0.s8 %v369_v42  ;;  %v609_v14 = vunpack.c.1.s8 %v369_v42  ;;  %1056 = vmatmul.bf16.vlgmr.msra.gmra.mxu2 %v1972_v1  ;;  %v353_v5 = vld [vmem:[%s1936_s7 + $0x150] sm:$0xff] }
  0x8a   : > { %1087 = vmatpush.bf16.msrb.mxu1 %v1009_v7  ;;  %v1010_v16 = vpack.c.bf16 %v882_v9, %v874_v8  ;;  %v737_v17 = vcvt.s32.f32 %v481_v10  ;;  %v474_v18 = vunpack.c.0.s8 %v338_v47  ;;  %v482_v19 = vunpack.c.1.s8 %v338_v47  ;;  %1069 = vmatmul.bf16.vlgmr.msra.gmra.mxu3 %v1974_v6 }
  0x8b   : > { %1100 = vmatpush.bf16.msrb.mxu2 %v946_v11  ;;  %v857_v20 = vcvt.s32.f32 %v601_v13  ;;  %v865_v21 = vcvt.s32.f32 %v609_v14  ;;  %v602_v22 = vunpack.c.0.s8 %v370_v52  ;;  %v610_v23 = vunpack.c.1.s8 %v370_v52  ;;  %v322_v11 = vld [vmem:[%s1936_s7 + $0x58] sm:$0xff] }
  0x8c   : > { %1113 = vmatpush.bf16.msrb.mxu3 %v1010_v16  ;;  %v937_v25 = vpack.c.bf16 %v737_v17, %v729_v12  ;;  %v730_v26 = vcvt.s32.f32 %v474_v18  ;;  %v738_v27 = vcvt.s32.f32 %v482_v19  ;;  %v457_v28 = vunpack.c.2.s8 %v329_v15  ;;  %v354_v16 = vld [vmem:[%s1936_s7 + $0x158] sm:$0xff] }
  0x8d   : > { %v1001_v30 = vpack.c.bf16 %v865_v21, %v857_v20  ;;  %v858_v31 = vcvt.s32.f32 %v602_v22  ;;  %v866_v32 = vcvt.s32.f32 %v610_v23  ;;  %v465_v33 = vunpack.c.3.s8 %v329_v15 }
  0x8e   : > { %1075 = vmatpush.bf16.msrb.mxu0 %v937_v25  ;;  %v938_v35 = vpack.c.bf16 %v738_v27, %v730_v26  ;;  %v713_v36 = vcvt.s32.f32 %v457_v28  ;;  %v585_v37 = vunpack.c.2.s8 %v361_v24  ;;  %v593_v38 = vunpack.c.3.s8 %v361_v24 }
  0x8f   : > { %1088 = vmatpush.bf16.msrb.mxu1 %v1001_v30  ;;  %v1002_v39 = vpack.c.bf16 %v866_v32, %v858_v31  ;;  %v721_v40 = vcvt.s32.f32 %v465_v33  ;;  %v458_v41 = vunpack.c.2.s8 %v330_v29  ;;  %v466_v42 = vunpack.c.3.s8 %v330_v29 }
  0x90   : > { %1101 = vmatpush.bf16.msrb.mxu2 %v938_v35  ;;  %v841_v43 = vcvt.s32.f32 %v585_v37  ;;  %v849_v44 = vcvt.s32.f32 %v593_v38  ;;  %v586_v45 = vunpack.c.2.s8 %v362_v34  ;;  %v594_v46 = vunpack.c.3.s8 %v362_v34 }
  0x91   : > { %1114 = vmatpush.bf16.msrb.mxu3 %v1002_v39  ;;  %v929_v47 = vpack.c.bf16 %v721_v40, %v713_v36  ;;  %v714_v48 = vcvt.s32.f32 %v458_v41  ;;  %v722_v49 = vcvt.s32.f32 %v466_v42  ;;  %v441_v50 = vunpack.c.0.s8 %v329_v15  ;;  %v313_v41 = vld [vmem:[%s1936_s7 + $0x10] sm:$0xff] }
  0x92   : > { %v993_v51 = vpack.c.bf16 %v849_v44, %v841_v43  ;;  %v842_v52 = vcvt.s32.f32 %v586_v45  ;;  %v850_v53 = vcvt.s32.f32 %v594_v46  ;;  %v449_v54 = vunpack.c.1.s8 %v329_v15 }
  0x93   : > { %1076 = vmatpush.bf16.msrb.mxu0 %v929_v47  ;;  %v930_v55 = vpack.c.bf16 %v722_v49, %v714_v48  ;;  %v697_v56 = vcvt.s32.f32 %v441_v50  ;;  %v569_v57 = vunpack.c.0.s8 %v361_v24  ;;  %v577_v58 = vunpack.c.1.s8 %v361_v24  ;;  %v345_v50 = vld [vmem:[%s1936_s7 + $0x110] sm:$0xff] }
  0x94   : > { %1089 = vmatpush.bf16.msrb.mxu1 %v993_v51  ;;  %v994_v60 = vpack.c.bf16 %v850_v53, %v842_v52  ;;  %v705_v61 = vcvt.s32.f32 %v449_v54  ;;  %v442_v62 = vunpack.c.0.s8 %v330_v29  ;;  %v450_v63 = vunpack.c.1.s8 %v330_v29 }
  0x95   : > { %1102 = vmatpush.bf16.msrb.mxu2 %v930_v55  ;;  %v825_v0 = vcvt.s32.f32 %v569_v57  ;;  %v833_v2 = vcvt.s32.f32 %v577_v58  ;;  %v570_v3 = vunpack.c.0.s8 %v362_v34  ;;  %v578_v4 = vunpack.c.1.s8 %v362_v34  ;;  %v314_v55 = vld [vmem:[%s1936_s7 + $0x18] sm:$0xff] }
  0x96   : > { %1115 = vmatpush.bf16.msrb.mxu3 %v994_v60  ;;  %v921_v7 = vpack.c.bf16 %v705_v61, %v697_v56  ;;  %v698_v8 = vcvt.s32.f32 %v442_v62  ;;  %v706_v9 = vcvt.s32.f32 %v450_v63  ;;  %v425_v10 = vunpack.c.2.s8 %v321_v59  ;;  %v346_v60 = vld [vmem:[%s1936_s7 + $0x118] sm:$0xff] }
  0x97   : > { %v985_v12 = vpack.c.bf16 %v833_v2, %v825_v0  ;;  %v826_v13 = vcvt.s32.f32 %v570_v3  ;;  %v834_v14 = vcvt.s32.f32 %v578_v4  ;;  %v433_v15 = vunpack.c.3.s8 %v321_v59 }
  0x98   : > { %1077 = vmatpush.bf16.msrb.mxu0 %v921_v7  ;;  %v922_v17 = vpack.c.bf16 %v706_v9, %v698_v8  ;;  %v681_v18 = vcvt.s32.f32 %v425_v10  ;;  %v553_v19 = vunpack.c.2.s8 %v353_v5  ;;  %v561_v20 = vunpack.c.3.s8 %v353_v5 }
  0x99   : > { %1090 = vmatpush.bf16.msrb.mxu1 %v985_v12  ;;  %v986_v21 = vpack.c.bf16 %v834_v14, %v826_v13  ;;  %v689_v22 = vcvt.s32.f32 %v433_v15  ;;  %v426_v23 = vunpack.c.2.s8 %v322_v11  ;;  %v434_v24 = vunpack.c.3.s8 %v322_v11 }
  0x9a   : > { %1103 = vmatpush.bf16.msrb.mxu2 %v922_v17  ;;  %v809_v25 = vcvt.s32.f32 %v553_v19  ;;  %v817_v26 = vcvt.s32.f32 %v561_v20  ;;  %v554_v27 = vunpack.c.2.s8 %v354_v16  ;;  %v562_v28 = vunpack.c.3.s8 %v354_v16 }
  0x9b   : > { %1116 = vmatpush.bf16.msrb.mxu3 %v986_v21  ;;  %v913_v29 = vpack.c.bf16 %v689_v22, %v681_v18  ;;  %v682_v30 = vcvt.s32.f32 %v426_v23  ;;  %v690_v31 = vcvt.s32.f32 %v434_v24  ;;  %v409_v32 = vunpack.c.0.s8 %v321_v59  ;;  %v339_v23 = vld [vmem:[%s1936_s7 + $0xe0] sm:$0xff] }
  0x9c   : > { %v977_v33 = vpack.c.bf16 %v817_v26, %v809_v25  ;;  %v810_v34 = vcvt.s32.f32 %v554_v27  ;;  %v818_v35 = vcvt.s32.f32 %v562_v28  ;;  %v417_v36 = vunpack.c.1.s8 %v321_v59 }
  0x9d   : > { %1078 = vmatpush.bf16.msrb.mxu0 %v913_v29  ;;  %v914_v37 = vpack.c.bf16 %v690_v31, %v682_v30  ;;  %v665_v38 = vcvt.s32.f32 %v409_v32  ;;  %v537_v39 = vunpack.c.0.s8 %v353_v5  ;;  %v545_v40 = vunpack.c.1.s8 %v353_v5  ;;  %v371_v32 = vld [vmem:[%s1936_s7 + $0x1e0] sm:$0xff] }
  0x9e   : > { %1091 = vmatpush.bf16.msrb.mxu1 %v977_v33  ;;  %v978_v42 = vpack.c.bf16 %v818_v35, %v810_v34  ;;  %v673_v43 = vcvt.s32.f32 %v417_v36  ;;  %v410_v44 = vunpack.c.0.s8 %v322_v11  ;;  %v418_v45 = vunpack.c.1.s8 %v322_v11 }
  0x9f   : > { %1104 = vmatpush.bf16.msrb.mxu2 %v914_v37  ;;  %v793_v46 = vcvt.s32.f32 %v537_v39  ;;  %v801_v47 = vcvt.s32.f32 %v545_v40  ;;  %v538_v48 = vunpack.c.0.s8 %v354_v16  ;;  %v546_v49 = vunpack.c.1.s8 %v354_v16  ;;  %v340_v37 = vld [vmem:[%s1936_s7 + $0xe8] sm:$0xff] }
  0xa0   : > { %1117 = vmatpush.bf16.msrb.mxu3 %v978_v42  ;;  %v905_v51 = vpack.c.bf16 %v673_v43, %v665_v38  ;;  %v666_v52 = vcvt.s32.f32 %v410_v44  ;;  %v674_v53 = vcvt.s32.f32 %v418_v45  ;;  %v393_v54 = vunpack.c.2.s8 %v313_v41  ;;  %v372_v42 = vld [vmem:[%s1936_s7 + $0x1e8] sm:$0xff] }
  0xa1   : > { %v969_v56 = vpack.c.bf16 %v801_v47, %v793_v46  ;;  %v794_v57 = vcvt.s32.f32 %v538_v48  ;;  %v802_v58 = vcvt.s32.f32 %v546_v49  ;;  %v401_v59 = vunpack.c.3.s8 %v313_v41 }
  0xa2   : > { %1079 = vmatpush.bf16.msrb.mxu0 %v905_v51  ;;  %v906_v61 = vpack.c.bf16 %v674_v53, %v666_v52  ;;  %v649_v62 = vcvt.s32.f32 %v393_v54  ;;  %v521_v63 = vunpack.c.2.s8 %v345_v50  ;;  %v529_v0 = vunpack.c.3.s8 %v345_v50 }
  0xa3   : > { %1092 = vmatpush.bf16.msrb.mxu1 %v969_v56  ;;  %v970_v2 = vpack.c.bf16 %v802_v58, %v794_v57  ;;  %v657_v3 = vcvt.s32.f32 %v401_v59  ;;  %v394_v4 = vunpack.c.2.s8 %v314_v55  ;;  %v402_v5 = vunpack.c.3.s8 %v314_v55 }
  0xa4   : > { %1105 = vmatpush.bf16.msrb.mxu2 %v906_v61  ;;  %v777_v7 = vcvt.s32.f32 %v521_v63  ;;  %v785_v8 = vcvt.s32.f32 %v529_v0  ;;  %v522_v9 = vunpack.c.2.s8 %v346_v60  ;;  %v530_v10 = vunpack.c.3.s8 %v346_v60 }
  0xa5   : > { %1118 = vmatpush.bf16.msrb.mxu3 %v970_v2  ;;  %v897_v11 = vpack.c.bf16 %v657_v3, %v649_v62  ;;  %v650_v12 = vcvt.s32.f32 %v394_v4  ;;  %v658_v13 = vcvt.s32.f32 %v402_v5  ;;  %v377_v14 = vunpack.c.0.s8 %v313_v41  ;;  %v331_v4 = vld [vmem:[%s1936_s7 + $0xa0] sm:$0xff] }
  0xa6   : > { %v961_v15 = vpack.c.bf16 %v785_v8, %v777_v7  ;;  %v778_v16 = vcvt.s32.f32 %v522_v9  ;;  %v786_v17 = vcvt.s32.f32 %v530_v10  ;;  %v385_v18 = vunpack.c.1.s8 %v313_v41 }
  0xa7   : > { %1080 = vmatpush.bf16.msrb.mxu0 %v897_v11  ;;  %v898_v19 = vpack.c.bf16 %v658_v13, %v650_v12  ;;  %v633_v20 = vcvt.s32.f32 %v377_v14  ;;  %v505_v21 = vunpack.c.0.s8 %v345_v50  ;;  %v513_v22 = vunpack.c.1.s8 %v345_v50  ;;  %v363_v14 = vld [vmem:[%s1936_s7 + $0x1a0] sm:$0xff] }
  0xa8   : > { %1093 = vmatpush.bf16.msrb.mxu1 %v961_v15  ;;  %v962_v24 = vpack.c.bf16 %v786_v17, %v778_v16  ;;  %v641_v25 = vcvt.s32.f32 %v385_v18  ;;  %v378_v26 = vunpack.c.0.s8 %v314_v55  ;;  %v386_v27 = vunpack.c.1.s8 %v314_v55 }
  0xa9   : > { %1106 = vmatpush.bf16.msrb.mxu2 %v898_v19  ;;  %v761_v28 = vcvt.s32.f32 %v505_v21  ;;  %v769_v29 = vcvt.s32.f32 %v513_v22  ;;  %v506_v30 = vunpack.c.0.s8 %v346_v60  ;;  %v514_v31 = vunpack.c.1.s8 %v346_v60  ;;  %v332_v19 = vld [vmem:[%s1936_s7 + $0xa8] sm:$0xff] }
  0xaa   : > { %1119 = vmatpush.bf16.msrb.mxu3 %v962_v24  ;;  %v889_v33 = vpack.c.bf16 %v641_v25, %v633_v20  ;;  %v634_v34 = vcvt.s32.f32 %v378_v26  ;;  %v642_v35 = vcvt.s32.f32 %v386_v27  ;;  %v491_v36 = vunpack.c.2.s8 %v339_v23  ;;  %v364_v24 = vld [vmem:[%s1936_s7 + $0x1a8] sm:$0xff] }
  0xab   : > { %v953_v38 = vpack.c.bf16 %v769_v29, %v761_v28  ;;  %v762_v39 = vcvt.s32.f32 %v506_v30  ;;  %v770_v40 = vcvt.s32.f32 %v514_v31  ;;  %v499_v41 = vunpack.c.3.s8 %v339_v23 }
  0xac   : > { %1081 = vmatpush.bf16.msrb.mxu0 %v889_v33  ;;  %v890_v43 = vpack.c.bf16 %v642_v35, %v634_v34  ;;  %v747_v44 = vcvt.s32.f32 %v491_v36  ;;  %v619_v45 = vunpack.c.2.s8 %v371_v32  ;;  %v627_v46 = vunpack.c.3.s8 %v371_v32 }
  0xad   : > { %1094 = vmatpush.bf16.msrb.mxu1 %v953_v38  ;;  %v954_v47 = vpack.c.bf16 %v770_v40, %v762_v39  ;;  %v755_v48 = vcvt.s32.f32 %v499_v41  ;;  %v492_v49 = vunpack.c.2.s8 %v340_v37  ;;  %v500_v50 = vunpack.c.3.s8 %v340_v37 }
  0xae   : > { %1107 = vmatpush.bf16.msrb.mxu2 %v890_v43  ;;  %v875_v51 = vcvt.s32.f32 %v619_v45  ;;  %v883_v52 = vcvt.s32.f32 %v627_v46  ;;  %v620_v53 = vunpack.c.2.s8 %v372_v42  ;;  %v628_v54 = vunpack.c.3.s8 %v372_v42 }
  0xaf   : > { %1120 = vmatpush.bf16.msrb.mxu3 %v954_v47  ;;  %v947_v55 = vpack.c.bf16 %v755_v48, %v747_v44  ;;  %v748_v56 = vcvt.s32.f32 %v492_v49  ;;  %v756_v57 = vcvt.s32.f32 %v500_v50  ;;  %v475_v58 = vunpack.c.0.s8 %v339_v23  ;;  %1082 = vmatmul.bf16.vlgmr.msrb.gmra.mxu0 %v1972_v1  ;;  %v323_v49 = vld [vmem:[%s1936_s7 + $0x60] sm:$0xff] }
  0xb0   : > { %v1011_v59 = vpack.c.bf16 %v883_v52, %v875_v51  ;;  %v876_v60 = vcvt.s32.f32 %v620_v53  ;;  %v884_v61 = vcvt.s32.f32 %v628_v54  ;;  %v483_v62 = vunpack.c.1.s8 %v339_v23  ;;  %1095 = vmatmul.bf16.vlgmr.msrb.gmra.mxu1 %v1974_v6 }
  0xb1   : > { %1126 = vmatpush.bf16.msra.mxu0 %v947_v55  ;;  %v948_v63 = vpack.c.bf16 %v756_v57, %v748_v56  ;;  %1108 = vmatmul.bf16.vlgmr.msrb.gmra.mxu2 %v1972_v1  ;;  %v731_v0 = vcvt.s32.f32 %v475_v58  ;;  %v603_v2 = vunpack.c.0.s8 %v371_v32  ;;  %v611_v3 = vunpack.c.1.s8 %v371_v32  ;;  %v355_v58 = vld [vmem:[%s1936_s7 + $0x160] sm:$0xff] }
  0xb2   : > { %1139 = vmatpush.bf16.msra.mxu1 %v1011_v59  ;;  %v1012_v5 = vpack.c.bf16 %v884_v61, %v876_v60  ;;  %1121 = vmatmul.bf16.vlgmr.msrb.gmra.mxu3 %v1974_v6  ;;  %v739_v7 = vcvt.s32.f32 %v483_v62  ;;  %v476_v8 = vunpack.c.0.s8 %v340_v37  ;;  %v484_v9 = vunpack.c.1.s8 %v340_v37 }
  0xb3   : > { %1152 = vmatpush.bf16.msra.mxu2 %v948_v63  ;;  %v859_v10 = vcvt.s32.f32 %v603_v2  ;;  %v867_v11 = vcvt.s32.f32 %v611_v3  ;;  %v604_v12 = vunpack.c.0.s8 %v372_v42  ;;  %v612_v13 = vunpack.c.1.s8 %v372_v42  ;;  %v324_v63 = vld [vmem:[%s1936_s7 + $0x68] sm:$0xff] }
  0xb4   : > { %1165 = vmatpush.bf16.msra.mxu3 %v1012_v5  ;;  %v939_v15 = vpack.c.bf16 %v739_v7, %v731_v0  ;;  %v732_v16 = vcvt.s32.f32 %v476_v8  ;;  %v740_v17 = vcvt.s32.f32 %v484_v9  ;;  %v459_v18 = vunpack.c.2.s8 %v331_v4  ;;  %v356_v5 = vld [vmem:[%s1936_s7 + $0x168] sm:$0xff] }
  0xb5   : > { %v1003_v20 = vpack.c.bf16 %v867_v11, %v859_v10  ;;  %v860_v21 = vcvt.s32.f32 %v604_v12  ;;  %v868_v22 = vcvt.s32.f32 %v612_v13  ;;  %v467_v23 = vunpack.c.3.s8 %v331_v4 }
  0xb6   : > { %1127 = vmatpush.bf16.msra.mxu0 %v939_v15  ;;  %v940_v25 = vpack.c.bf16 %v740_v17, %v732_v16  ;;  %v715_v26 = vcvt.s32.f32 %v459_v18  ;;  %v587_v27 = vunpack.c.2.s8 %v363_v14  ;;  %v595_v28 = vunpack.c.3.s8 %v363_v14 }
  0xb7   : > { %1140 = vmatpush.bf16.msra.mxu1 %v1003_v20  ;;  %v1004_v29 = vpack.c.bf16 %v868_v22, %v860_v21  ;;  %v723_v30 = vcvt.s32.f32 %v467_v23  ;;  %v460_v31 = vunpack.c.2.s8 %v332_v19  ;;  %v468_v32 = vunpack.c.3.s8 %v332_v19 }
  0xb8   : > { %1153 = vmatpush.bf16.msra.mxu2 %v940_v25  ;;  %v843_v33 = vcvt.s32.f32 %v587_v27  ;;  %v851_v34 = vcvt.s32.f32 %v595_v28  ;;  %v588_v35 = vunpack.c.2.s8 %v364_v24  ;;  %v596_v36 = vunpack.c.3.s8 %v364_v24 }
  0xb9   : > { %1166 = vmatpush.bf16.msra.mxu3 %v1004_v29  ;;  %v931_v37 = vpack.c.bf16 %v723_v30, %v715_v26  ;;  %v716_v38 = vcvt.s32.f32 %v460_v31  ;;  %v724_v39 = vcvt.s32.f32 %v468_v32  ;;  %v443_v40 = vunpack.c.0.s8 %v331_v4  ;;  %v315_v31 = vld [vmem:[%s1936_s7 + $0x20] sm:$0xff] }
  0xba   : > { %v995_v41 = vpack.c.bf16 %v851_v34, %v843_v33  ;;  %v844_v42 = vcvt.s32.f32 %v588_v35  ;;  %v852_v43 = vcvt.s32.f32 %v596_v36  ;;  %v451_v44 = vunpack.c.1.s8 %v331_v4 }
  0xbb   : > { %1128 = vmatpush.bf16.msra.mxu0 %v931_v37  ;;  %v932_v45 = vpack.c.bf16 %v724_v39, %v716_v38  ;;  %v699_v46 = vcvt.s32.f32 %v443_v40  ;;  %v571_v47 = vunpack.c.0.s8 %v363_v14  ;;  %v579_v48 = vunpack.c.1.s8 %v363_v14  ;;  %v347_v40 = vld [vmem:[%s1936_s7 + $0x120] sm:$0xff] }
  0xbc   : > { %1141 = vmatpush.bf16.msra.mxu1 %v995_v41  ;;  %v996_v50 = vpack.c.bf16 %v852_v43, %v844_v42  ;;  %v707_v51 = vcvt.s32.f32 %v451_v44  ;;  %v444_v52 = vunpack.c.0.s8 %v332_v19  ;;  %v452_v53 = vunpack.c.1.s8 %v332_v19 }
  0xbd   : > { %1154 = vmatpush.bf16.msra.mxu2 %v932_v45  ;;  %v827_v54 = vcvt.s32.f32 %v571_v47  ;;  %v835_v55 = vcvt.s32.f32 %v579_v48  ;;  %v572_v56 = vunpack.c.0.s8 %v364_v24  ;;  %v580_v57 = vunpack.c.1.s8 %v364_v24  ;;  %v316_v45 = vld [vmem:[%s1936_s7 + $0x28] sm:$0xff] }
  0xbe   : > { %1167 = vmatpush.bf16.msra.mxu3 %v996_v50  ;;  %v923_v59 = vpack.c.bf16 %v707_v51, %v699_v46  ;;  %v700_v60 = vcvt.s32.f32 %v444_v52  ;;  %v708_v61 = vcvt.s32.f32 %v452_v53  ;;  %v427_v62 = vunpack.c.2.s8 %v323_v49  ;;  %v348_v50 = vld [vmem:[%s1936_s7 + $0x128] sm:$0xff] }
  0xbf   : > { %v987_v0 = vpack.c.bf16 %v835_v55, %v827_v54  ;;  %v828_v2 = vcvt.s32.f32 %v572_v56  ;;  %v836_v3 = vcvt.s32.f32 %v580_v57  ;;  %v435_v4 = vunpack.c.3.s8 %v323_v49 }
  0xc0   : > { %1129 = vmatpush.bf16.msra.mxu0 %v923_v59  ;;  %v924_v7 = vpack.c.bf16 %v708_v61, %v700_v60  ;;  %v683_v8 = vcvt.s32.f32 %v427_v62  ;;  %v555_v9 = vunpack.c.2.s8 %v355_v58  ;;  %v563_v10 = vunpack.c.3.s8 %v355_v58 }
  0xc1   : > { %1142 = vmatpush.bf16.msra.mxu1 %v987_v0  ;;  %v988_v11 = vpack.c.bf16 %v836_v3, %v828_v2  ;;  %v691_v12 = vcvt.s32.f32 %v435_v4  ;;  %v428_v13 = vunpack.c.2.s8 %v324_v63  ;;  %v436_v14 = vunpack.c.3.s8 %v324_v63 }
  0xc2   : > { %1155 = vmatpush.bf16.msra.mxu2 %v924_v7  ;;  %v811_v15 = vcvt.s32.f32 %v555_v9  ;;  %v819_v16 = vcvt.s32.f32 %v563_v10  ;;  %v556_v17 = vunpack.c.2.s8 %v356_v5  ;;  %v564_v18 = vunpack.c.3.s8 %v356_v5 }
  0xc3   : > { %1168 = vmatpush.bf16.msra.mxu3 %v988_v11  ;;  %v915_v19 = vpack.c.bf16 %v691_v12, %v683_v8  ;;  %v684_v20 = vcvt.s32.f32 %v428_v13  ;;  %v692_v21 = vcvt.s32.f32 %v436_v14  ;;  %v411_v22 = vunpack.c.0.s8 %v323_v49  ;;  %v341_v13 = vld [vmem:[%s1936_s7 + $0xf0] sm:$0xff] }
  0xc4   : > { %v979_v23 = vpack.c.bf16 %v819_v16, %v811_v15  ;;  %v812_v24 = vcvt.s32.f32 %v556_v17  ;;  %v820_v25 = vcvt.s32.f32 %v564_v18  ;;  %v419_v26 = vunpack.c.1.s8 %v323_v49 }
  0xc5   : > { %1130 = vmatpush.bf16.msra.mxu0 %v915_v19  ;;  %v916_v27 = vpack.c.bf16 %v692_v21, %v684_v20  ;;  %v667_v28 = vcvt.s32.f32 %v411_v22  ;;  %v539_v29 = vunpack.c.0.s8 %v355_v58  ;;  %v547_v30 = vunpack.c.1.s8 %v355_v58  ;;  %v373_v22 = vld [vmem:[%s1936_s7 + $0x1f0] sm:$0xff] }
  0xc6   : > { %1143 = vmatpush.bf16.msra.mxu1 %v979_v23  ;;  %v980_v32 = vpack.c.bf16 %v820_v25, %v812_v24  ;;  %v675_v33 = vcvt.s32.f32 %v419_v26  ;;  %v412_v34 = vunpack.c.0.s8 %v324_v63  ;;  %v420_v35 = vunpack.c.1.s8 %v324_v63 }
  0xc7   : > { %1156 = vmatpush.bf16.msra.mxu2 %v916_v27  ;;  %v795_v36 = vcvt.s32.f32 %v539_v29  ;;  %v803_v37 = vcvt.s32.f32 %v547_v30  ;;  %v540_v38 = vunpack.c.0.s8 %v356_v5  ;;  %v548_v39 = vunpack.c.1.s8 %v356_v5  ;;  %v342_v27 = vld [vmem:[%s1936_s7 + $0xf8] sm:$0xff] }
  0xc8   : > { %1169 = vmatpush.bf16.msra.mxu3 %v980_v32  ;;  %v907_v41 = vpack.c.bf16 %v675_v33, %v667_v28  ;;  %v668_v42 = vcvt.s32.f32 %v412_v34  ;;  %v676_v43 = vcvt.s32.f32 %v420_v35  ;;  %v395_v44 = vunpack.c.2.s8 %v315_v31  ;;  %v374_v32 = vld [vmem:[%s1936_s7 + $0x1f8] sm:$0xff] }
  0xc9   : > { %v971_v46 = vpack.c.bf16 %v803_v37, %v795_v36  ;;  %v796_v47 = vcvt.s32.f32 %v540_v38  ;;  %v804_v48 = vcvt.s32.f32 %v548_v39  ;;  %v403_v49 = vunpack.c.3.s8 %v315_v31 }
  0xca   : > { %1131 = vmatpush.bf16.msra.mxu0 %v907_v41  ;;  %v908_v51 = vpack.c.bf16 %v676_v43, %v668_v42  ;;  %v651_v52 = vcvt.s32.f32 %v395_v44  ;;  %v523_v53 = vunpack.c.2.s8 %v347_v40  ;;  %v531_v54 = vunpack.c.3.s8 %v347_v40 }
  0xcb   : > { %1144 = vmatpush.bf16.msra.mxu1 %v971_v46  ;;  %v972_v55 = vpack.c.bf16 %v804_v48, %v796_v47  ;;  %v659_v56 = vcvt.s32.f32 %v403_v49  ;;  %v396_v57 = vunpack.c.2.s8 %v316_v45  ;;  %v404_v58 = vunpack.c.3.s8 %v316_v45 }
  0xcc   : > { %1157 = vmatpush.bf16.msra.mxu2 %v908_v51  ;;  %v779_v59 = vcvt.s32.f32 %v523_v53  ;;  %v787_v60 = vcvt.s32.f32 %v531_v54  ;;  %v524_v61 = vunpack.c.2.s8 %v348_v50  ;;  %v532_v62 = vunpack.c.3.s8 %v348_v50 }
  0xcd   : > { %1170 = vmatpush.bf16.msra.mxu3 %v972_v55  ;;  %v899_v63 = vpack.c.bf16 %v659_v56, %v651_v52  ;;  %v652_v0 = vcvt.s32.f32 %v396_v57  ;;  %v660_v2 = vcvt.s32.f32 %v404_v58  ;;  %v379_v3 = vunpack.c.0.s8 %v315_v31  ;;  %v333_v57 = vld [vmem:[%s1936_s7 + $0xb0] sm:$0xff] }
  0xce   : > { %v963_v4 = vpack.c.bf16 %v787_v60, %v779_v59  ;;  %v780_v5 = vcvt.s32.f32 %v524_v61  ;;  %v788_v7 = vcvt.s32.f32 %v532_v62  ;;  %v387_v8 = vunpack.c.1.s8 %v315_v31 }
  0xcf   : > { %1132 = vmatpush.bf16.msra.mxu0 %v899_v63  ;;  %v900_v9 = vpack.c.bf16 %v660_v2, %v652_v0  ;;  %v635_v10 = vcvt.s32.f32 %v379_v3  ;;  %v507_v11 = vunpack.c.0.s8 %v347_v40  ;;  %v515_v12 = vunpack.c.1.s8 %v347_v40  ;;  %v365_v3 = vld [vmem:[%s1936_s7 + $0x1b0] sm:$0xff] }
  0xd0   : > { %1145 = vmatpush.bf16.msra.mxu1 %v963_v4  ;;  %v964_v14 = vpack.c.bf16 %v788_v7, %v780_v5  ;;  %v643_v15 = vcvt.s32.f32 %v387_v8  ;;  %v380_v16 = vunpack.c.0.s8 %v316_v45  ;;  %v388_v17 = vunpack.c.1.s8 %v316_v45  ;;  %v334_v8 = vld [vmem:[%s1936_s7 + $0xb8] sm:$0xff] }
  0xd1   : > { %1158 = vmatpush.bf16.msra.mxu2 %v900_v9  ;;  %v763_v18 = vcvt.s32.f32 %v507_v11  ;;  %v771_v19 = vcvt.s32.f32 %v515_v12  ;;  %v508_v20 = vunpack.c.0.s8 %v348_v50  ;;  %v516_v21 = vunpack.c.1.s8 %v348_v50 }
  0xd2   : > { %1171 = vmatpush.bf16.msra.mxu3 %v964_v14  ;;  %v891_v23 = vpack.c.bf16 %v643_v15, %v635_v10  ;;  %v636_v24 = vcvt.s32.f32 %v380_v16  ;;  %v644_v25 = vcvt.s32.f32 %v388_v17  ;;  %v493_v26 = vunpack.c.2.s8 %v341_v13 }
  0xd3   : > { %v955_v28 = vpack.c.bf16 %v771_v19, %v763_v18  ;;  %v764_v29 = vcvt.s32.f32 %v508_v20  ;;  %v772_v30 = vcvt.s32.f32 %v516_v21  ;;  %v501_v31 = vunpack.c.3.s8 %v341_v13 }
  0xd4   : > { %1133 = vmatpush.bf16.msra.mxu0 %v891_v23  ;;  %v892_v33 = vpack.c.bf16 %v644_v25, %v636_v24  ;;  %v749_v34 = vcvt.s32.f32 %v493_v26  ;;  %v621_v35 = vunpack.c.2.s8 %v373_v22  ;;  %v629_v36 = vunpack.c.3.s8 %v373_v22 }
  0xd5   : > { %1146 = vmatpush.bf16.msra.mxu1 %v955_v28  ;;  %v956_v37 = vpack.c.bf16 %v772_v30, %v764_v29  ;;  %v757_v38 = vcvt.s32.f32 %v501_v31  ;;  %v494_v39 = vunpack.c.2.s8 %v342_v27  ;;  %v502_v40 = vunpack.c.3.s8 %v342_v27 }
  0xd6   : > { %1159 = vmatpush.bf16.msra.mxu2 %v892_v33  ;;  %v877_v41 = vcvt.s32.f32 %v621_v35  ;;  %v885_v42 = vcvt.s32.f32 %v629_v36  ;;  %v622_v43 = vunpack.c.2.s8 %v374_v32  ;;  %v630_v44 = vunpack.c.3.s8 %v374_v32 }
  0xd7   : > { %1172 = vmatpush.bf16.msra.mxu3 %v956_v37  ;;  %v949_v45 = vpack.c.bf16 %v757_v38, %v749_v34  ;;  %v750_v46 = vcvt.s32.f32 %v494_v39  ;;  %v758_v47 = vcvt.s32.f32 %v502_v40  ;;  %v477_v48 = vunpack.c.0.s8 %v341_v13  ;;  %1134 = vmatmul.bf16.vlgmr.msra.gmra.mxu0 %v1972_v1  ;;  %v325_v37 = vld [vmem:[%s1936_s7 + $0x70] sm:$0xff] }
  0xd8   : > { %v1013_v49 = vpack.c.bf16 %v885_v42, %v877_v41  ;;  %v878_v50 = vcvt.s32.f32 %v622_v43  ;;  %v886_v51 = vcvt.s32.f32 %v630_v44  ;;  %v485_v52 = vunpack.c.1.s8 %v341_v13  ;;  %1147 = vmatmul.bf16.vlgmr.msra.gmra.mxu1 %v1974_v6  ;;  %v366_v13 = vld [vmem:[%s1936_s7 + $0x1b8] sm:$0xff] }
  0xd9   : > { %1178 = vmatpush.bf16.msrb.mxu0 %v949_v45  ;;  %v950_v53 = vpack.c.bf16 %v758_v47, %v750_v46  ;;  %v733_v54 = vcvt.s32.f32 %v477_v48  ;;  %v605_v55 = vunpack.c.0.s8 %v373_v22  ;;  %v613_v56 = vunpack.c.1.s8 %v373_v22  ;;  %1160 = vmatmul.bf16.vlgmr.msra.gmra.mxu2 %v1972_v1  ;;  %v357_v46 = vld [vmem:[%s1936_s7 + $0x170] sm:$0xff] }
  0xda   : > { %1191 = vmatpush.bf16.msrb.mxu1 %v1013_v49  ;;  %v1014_v58 = vpack.c.bf16 %v886_v51, %v878_v50  ;;  %v741_v59 = vcvt.s32.f32 %v485_v52  ;;  %v478_v60 = vunpack.c.0.s8 %v342_v27  ;;  %v486_v61 = vunpack.c.1.s8 %v342_v27  ;;  %1173 = vmatmul.bf16.vlgmr.msra.gmra.mxu3 %v1974_v6  ;;  %v326_v51 = vld [vmem:[%s1936_s7 + $0x78] sm:$0xff] }
  0xdb   : > { %1204 = vmatpush.bf16.msrb.mxu2 %v950_v53  ;;  %v861_v62 = vcvt.s32.f32 %v605_v55  ;;  %v869_v63 = vcvt.s32.f32 %v613_v56  ;;  %v606_v0 = vunpack.c.0.s8 %v374_v32  ;;  %v614_v2 = vunpack.c.1.s8 %v374_v32  ;;  %v358_v56 = vld [vmem:[%s1936_s7 + $0x178] sm:$0xff] }
  0xdc   : > { %1217 = vmatpush.bf16.msrb.mxu3 %v1014_v58  ;;  %v941_v4 = vpack.c.bf16 %v741_v59, %v733_v54  ;;  %v734_v5 = vcvt.s32.f32 %v478_v60  ;;  %v742_v1 = vcvt.s32.f32 %v486_v61  ;;  %v461_v7 = vunpack.c.2.s8 %v333_v57 }
  0xdd   : > { %v1005_v9 = vpack.c.bf16 %v869_v63, %v861_v62  ;;  %v862_v10 = vcvt.s32.f32 %v606_v0  ;;  %v870_v11 = vcvt.s32.f32 %v614_v2  ;;  %v469_v12 = vunpack.c.3.s8 %v333_v57 }
  0xde   : > { %1179 = vmatpush.bf16.msrb.mxu0 %v941_v4  ;;  %v942_v6 = vpack.c.bf16 %v742_v1, %v734_v5  ;;  %v717_v14 = vcvt.s32.f32 %v461_v7  ;;  %v589_v15 = vunpack.c.2.s8 %v365_v3  ;;  %v597_v16 = vunpack.c.3.s8 %v365_v3 }
  0xdf   : > { %1192 = vmatpush.bf16.msrb.mxu1 %v1005_v9  ;;  %v1006_v17 = vpack.c.bf16 %v870_v11, %v862_v10  ;;  %v725_v18 = vcvt.s32.f32 %v469_v12  ;;  %v462_v19 = vunpack.c.2.s8 %v334_v8  ;;  %v470_v20 = vunpack.c.3.s8 %v334_v8 }
  0xe0   : > { %1205 = vmatpush.bf16.msrb.mxu2 %v942_v6  ;;  %v845_v21 = vcvt.s32.f32 %v589_v15  ;;  %v853_v22 = vcvt.s32.f32 %v597_v16  ;;  %v590_v23 = vunpack.c.2.s8 %v366_v13  ;;  %v598_v24 = vunpack.c.3.s8 %v366_v13 }
  0xe1   : > { %1218 = vmatpush.bf16.msrb.mxu3 %v1006_v17  ;;  %v933_v25 = vpack.c.bf16 %v725_v18, %v717_v14  ;;  %v718_v26 = vcvt.s32.f32 %v462_v19  ;;  %v726_v27 = vcvt.s32.f32 %v470_v20  ;;  %v445_v28 = vunpack.c.0.s8 %v333_v57  ;;  %v317_v17 = vld [vmem:[%s1936_s7 + $0x30] sm:$0xff] }
  0xe2   : > { %v997_v29 = vpack.c.bf16 %v853_v22, %v845_v21  ;;  %v846_v30 = vcvt.s32.f32 %v590_v23  ;;  %v854_v31 = vcvt.s32.f32 %v598_v24  ;;  %v453_v32 = vunpack.c.1.s8 %v333_v57 }
  0xe3   : > { %1180 = vmatpush.bf16.msrb.mxu0 %v933_v25  ;;  %v934_v33 = vpack.c.bf16 %v726_v27, %v718_v26  ;;  %v701_v34 = vcvt.s32.f32 %v445_v28  ;;  %v573_v35 = vunpack.c.0.s8 %v365_v3  ;;  %v581_v36 = vunpack.c.1.s8 %v365_v3  ;;  %v349_v26 = vld [vmem:[%s1936_s7 + $0x130] sm:$0xff] }
  0xe4   : > { %1193 = vmatpush.bf16.msrb.mxu1 %v997_v29  ;;  %v998_v38 = vpack.c.bf16 %v854_v31, %v846_v30  ;;  %v709_v39 = vcvt.s32.f32 %v453_v32  ;;  %v446_v40 = vunpack.c.0.s8 %v334_v8  ;;  %v454_v41 = vunpack.c.1.s8 %v334_v8  ;;  %v318_v31 = vld [vmem:[%s1936_s7 + $0x38] sm:$0xff] }
  0xe5   : > { %1206 = vmatpush.bf16.msrb.mxu2 %v934_v33  ;;  %v829_v42 = vcvt.s32.f32 %v573_v35  ;;  %v837_v43 = vcvt.s32.f32 %v581_v36  ;;  %v574_v44 = vunpack.c.0.s8 %v366_v13  ;;  %v582_v45 = vunpack.c.1.s8 %v366_v13  ;;  %v350_v36 = vld [vmem:[%s1936_s7 + $0x138] sm:$0xff] }
  0xe6   : > { %1219 = vmatpush.bf16.msrb.mxu3 %v998_v38  ;;  %v925_v47 = vpack.c.bf16 %v709_v39, %v701_v34  ;;  %v702_v48 = vcvt.s32.f32 %v446_v40  ;;  %v710_v49 = vcvt.s32.f32 %v454_v41  ;;  %v429_v50 = vunpack.c.2.s8 %v325_v37 }
  0xe7   : > { %v989_v52 = vpack.c.bf16 %v837_v43, %v829_v42  ;;  %v830_v53 = vcvt.s32.f32 %v574_v44  ;;  %v838_v54 = vcvt.s32.f32 %v582_v45  ;;  %v437_v55 = vunpack.c.3.s8 %v325_v37 }
  0xe8   : > { %1181 = vmatpush.bf16.msrb.mxu0 %v925_v47  ;;  %v926_v57 = vpack.c.bf16 %v710_v49, %v702_v48  ;;  %v685_v58 = vcvt.s32.f32 %v429_v50  ;;  %v557_v59 = vunpack.c.2.s8 %v357_v46  ;;  %v565_v60 = vunpack.c.3.s8 %v357_v46 }
  0xe9   : > { %1194 = vmatpush.bf16.msrb.mxu1 %v989_v52  ;;  %v990_v61 = vpack.c.bf16 %v838_v54, %v830_v53  ;;  %v693_v62 = vcvt.s32.f32 %v437_v55  ;;  %v430_v63 = vunpack.c.2.s8 %v326_v51  ;;  %v438_v0 = vunpack.c.3.s8 %v326_v51 }
  0xea   : > { %1207 = vmatpush.bf16.msrb.mxu2 %v926_v57  ;;  %v813_v2 = vcvt.s32.f32 %v557_v59  ;;  %v821_v3 = vcvt.s32.f32 %v565_v60  ;;  %v558_v4 = vunpack.c.2.s8 %v358_v56  ;;  %v566_v5 = vunpack.c.3.s8 %v358_v56 }
  0xeb   : > { %1220 = vmatpush.bf16.msrb.mxu3 %v990_v61  ;;  %v917_v1 = vpack.c.bf16 %v693_v62, %v685_v58  ;;  %v686_v7 = vcvt.s32.f32 %v430_v63  ;;  %v694_v8 = vcvt.s32.f32 %v438_v0  ;;  %v413_v9 = vunpack.c.0.s8 %v325_v37 }
  0xec   : > { %v981_v10 = vpack.c.bf16 %v821_v3, %v813_v2  ;;  %v814_v11 = vcvt.s32.f32 %v558_v4  ;;  %v822_v12 = vcvt.s32.f32 %v566_v5  ;;  %v421_v13 = vunpack.c.1.s8 %v325_v37 }
  0xed   : > { %1182 = vmatpush.bf16.msrb.mxu0 %v917_v1  ;;  %v918_v6 = vpack.c.bf16 %v694_v8, %v686_v7  ;;  %v669_v14 = vcvt.s32.f32 %v413_v9  ;;  %v541_v15 = vunpack.c.0.s8 %v357_v46  ;;  %v549_v16 = vunpack.c.1.s8 %v357_v46 }
  0xee   : > { %1195 = vmatpush.bf16.msrb.mxu1 %v981_v10  ;;  %v982_v18 = vpack.c.bf16 %v822_v12, %v814_v11  ;;  %v677_v19 = vcvt.s32.f32 %v421_v13  ;;  %v414_v20 = vunpack.c.0.s8 %v326_v51  ;;  %v422_v21 = vunpack.c.1.s8 %v326_v51 }
  0xef   : > { %1208 = vmatpush.bf16.msrb.mxu2 %v918_v6  ;;  %v797_v22 = vcvt.s32.f32 %v541_v15  ;;  %v805_v23 = vcvt.s32.f32 %v549_v16  ;;  %v542_v24 = vunpack.c.0.s8 %v358_v56  ;;  %v550_v25 = vunpack.c.1.s8 %v358_v56  ;;  %v1561_v6 = vld [vmem:[#allocation1] sm:$0xff]  ;;  %v2034_v15 = vld [vmem:[%s262_s11] sm:$0xff] }
  0xf0   : > { %1221 = vmatpush.bf16.msrb.mxu3 %v982_v18  ;;  %v909_v27 = vpack.c.bf16 %v677_v19, %v669_v14  ;;  %v670_v28 = vcvt.s32.f32 %v414_v20  ;;  %v678_v29 = vcvt.s32.f32 %v422_v21  ;;  %v397_v30 = vunpack.c.2.s8 %v317_v17  ;;  %v1562_v14 = vld [vmem:[#allocation1 + $0x9] sm:$0xff] }
  0xf1   : > { %v973_v32 = vpack.c.bf16 %v805_v23, %v797_v22  ;;  %v798_v33 = vcvt.s32.f32 %v542_v24  ;;  %v806_v34 = vcvt.s32.f32 %v550_v25  ;;  %v405_v35 = vunpack.c.3.s8 %v317_v17  ;;  %v2039_v20 = vld [vmem:[%s272_s0] sm:$0xff] }
  0xf2   : > { %1183 = vmatpush.bf16.msrb.mxu0 %v909_v27  ;;  %v910_v37 = vpack.c.bf16 %v678_v29, %v670_v28  ;;  %v653_v38 = vcvt.s32.f32 %v397_v30  ;;  %v525_v39 = vunpack.c.2.s8 %v349_v26  ;;  %v533_v40 = vunpack.c.3.s8 %v349_v26 }
  0xf3   : > { %1196 = vmatpush.bf16.msrb.mxu1 %v973_v32  ;;  %v974_v41 = vpack.c.bf16 %v806_v34, %v798_v33  ;;  %v661_v42 = vcvt.s32.f32 %v405_v35  ;;  %v398_v43 = vunpack.c.2.s8 %v318_v31  ;;  %v406_v44 = vunpack.c.3.s8 %v318_v31 }
  0xf4   : > { %1209 = vmatpush.bf16.msrb.mxu2 %v910_v37  ;;  %v781_v45 = vcvt.s32.f32 %v525_v39  ;;  %v789_v46 = vcvt.s32.f32 %v533_v40  ;;  %v526_v47 = vunpack.c.2.s8 %v350_v36  ;;  %v534_v48 = vunpack.c.3.s8 %v350_v36 }
  0xf5   : > { %1222 = vmatpush.bf16.msrb.mxu3 %v974_v41  ;;  %v901_v49 = vpack.c.bf16 %v661_v42, %v653_v38  ;;  %v654_v50 = vcvt.s32.f32 %v398_v43  ;;  %v662_v51 = vcvt.s32.f32 %v406_v44  ;;  %v381_v52 = vunpack.c.0.s8 %v317_v17 }
  0xf6   : > { %v965_v53 = vpack.c.bf16 %v789_v46, %v781_v45  ;;  %v782_v54 = vcvt.s32.f32 %v526_v47  ;;  %v790_v55 = vcvt.s32.f32 %v534_v48  ;;  %v389_v56 = vunpack.c.1.s8 %v317_v17 }
  0xf7   : > { %1184 = vmatpush.bf16.msrb.mxu0 %v901_v49  ;;  %v902_v57 = vpack.c.bf16 %v662_v51, %v654_v50  ;;  %v637_v58 = vcvt.s32.f32 %v381_v52  ;;  %v509_v59 = vunpack.c.0.s8 %v349_v26  ;;  %v517_v60 = vunpack.c.1.s8 %v349_v26 }
  0xf8   : > { %1197 = vmatpush.bf16.msrb.mxu1 %v965_v53  ;;  %v966_v61 = vpack.c.bf16 %v790_v55, %v782_v54  ;;  %v645_v62 = vcvt.s32.f32 %v389_v56  ;;  %v382_v63 = vunpack.c.0.s8 %v318_v31  ;;  %v390_v0 = vunpack.c.1.s8 %v318_v31 }
  0xf9   : > { %1210 = vmatpush.bf16.msrb.mxu2 %v902_v57  ;;  %v765_v2 = vcvt.s32.f32 %v509_v59  ;;  %v773_v3 = vcvt.s32.f32 %v517_v60  ;;  %v510_v4 = vunpack.c.0.s8 %v350_v36  ;;  %v518_v5 = vunpack.c.1.s8 %v350_v36 }
  0xfa   : > { %1223 = vmatpush.bf16.msrb.mxu3 %v966_v61  ;;  %v893_v1 = vpack.c.bf16 %v645_v62, %v637_v58  ;;  %v638_v7 = vcvt.s32.f32 %v382_v63  ;;  %v646_v8 = vcvt.s32.f32 %v390_v0  ;;  %v1232_v19 = vperm.slane %v2034_v15, 0 }
  0xfb   : > { %v957_v9 = vpack.c.bf16 %v773_v3, %v765_v2  ;;  %v766_v10 = vcvt.s32.f32 %v510_v4  ;;  %v774_v11 = vcvt.s32.f32 %v518_v5  ;;  %v1258_v22 = vperm.slane %v2039_v20, 0 }
  0xfc   : > { %1185 = vmatpush.bf16.msrb.mxu0 %v893_v1  ;;  %v894_v12 = vpack.c.bf16 %v646_v8, %v638_v7  ;;  %v1233_v24 = vperm.slane %v2034_v15, 1  ;;  %v1259_v30 = vperm.slane %v2039_v20, 1  ;;  %v1234_v41 = vperm.slane %v2034_v15, 2 }
  0xfd   : > { %1198 = vmatpush.bf16.msrb.mxu1 %v957_v9  ;;  %v958_v13 = vpack.c.bf16 %v774_v11, %v766_v10  ;;  %v1260_v43 = vperm.slane %v2039_v20, 2  ;;  %v1235_v45 = vperm.slane %v2034_v15, 3  ;;  %v1261_v51 = vperm.slane %v2039_v20, 3 }
  0xfe   : > { %1211 = vmatpush.bf16.msrb.mxu2 %v894_v12  ;;  %v1236_v11 = vperm.slane %v2034_v15, 4  ;;  %vm1315_vm3 = vcmask 1044484   ;;  %vm1319_vm4 = vcmask 1046534   ;;  %vm1323_vm5 = vcmask 1045508  }
  0xff   : > { %1224 = vmatpush.bf16.msrb.mxu3 %v958_v13  ;;  %1186 = vmatmul.bf16.vlgmr.msrb.gmra.mxu0 %v1561_v6  ;;  %v1237_v13 = vperm.slane %v2034_v15, 5  ;;  %vm1325_vm6 = vcmask 1043456  }
 0x100   : > { %1199 = vmatmul.bf16.vlgmr.msrb.gmra.mxu1 %v1562_v14 }
 0x101   : > { %1212 = vmatmul.bf16.vlgmr.msrb.gmra.mxu2 %v1561_v6 }
 0x102   : > { %1225 = vmatmul.bf16.vlgmr.msrb.gmra.mxu3 %v1562_v14 }
 0x104   : > { %v1031_v16 = vpop.f32.mrf.mxu0 }
 0x105   : > { %v1044_v17 = vpop.f32.mrf.mxu1 }
 0x106   : > { %v1045_v18 = vadd.f32 %v1044_v17, %v1031_v16  ;;  %v1262_v16 = vperm.slane %v2039_v20, 4 }
 0x108   : > { %v1248_v21 = vmul.f32 %v1232_v19, %v1045_v18  ;;  %v1263_v19 = vperm.slane %v2039_v20, 5 }
 0x10a   : > { %v1274_v28 = vadd.f32 %v1258_v22, %v1248_v21  ;;  %v1238_v22 = vperm.slane %v2034_v15, 6 }
 0x10c   : > { %v1057_v23 = vpop.f32.mrf.mxu2  ;;  %v1033_v25 = vpop.f32.mrf.mxu0  ;;  %v1282_v32 = vmax.f32 %v1274_v28, 0.0  ;;  %v1239_v28 = vperm.slane %v2034_v15, 7 }
 0x10d   : > { %v1070_v26 = vpop.f32.mrf.mxu3  ;;  %v1046_v27 = vpop.f32.mrf.mxu1 }
 0x10e   : > { %v1071_v29 = vadd.f32 %v1070_v26, %v1057_v23  ;;  %v1264_v26 = vperm.slane %v2039_v20, 6 }
 0x110   : > { %v1249_v31 = vmul.f32 %v1233_v24, %v1071_v29 }
 0x112   : > { %v1275_v33 = vadd.f32 %v1259_v30, %v1249_v31 }
 0x114   : > { %v1283_v34 = vmax.f32 %v1275_v33, 0.0  ;;  %v1059_v35 = vpop.f32.mrf.mxu2 }
 0x115   : > { %v1072_v36 = vpop.f32.mrf.mxu3 }
 0x116   : > { %v1290_v37 = vpack.c.bf16 %v1283_v34, %v1282_v32  ;;  %v1265_v36 = vperm.slane %v2039_v20, 7 }
 0x118   : > { %v1298_v58 = vrot.slane %v1290_v37, 3 }
 0x11a   : > { %v1308_v62 = vsel %vm1305_vm0, %v1290_v37, %v1298_v58 }
 0x12c   : > { %v1083_v38 = vpop.f32.mrf.mxu0 }
 0x12d   : > { %v1096_v39 = vpop.f32.mrf.mxu1 }
 0x12e   : > { %v1097_v40 = vadd.f32 %v1096_v39, %v1083_v38 }
 0x130   : > { %v1250_v42 = vmul.f32 %v1234_v41, %v1097_v40 }
 0x132   : > { %v1276_v49 = vadd.f32 %v1260_v43, %v1250_v42 }
 0x134   : > { %v1109_v44 = vpop.f32.mrf.mxu2  ;;  %v1085_v46 = vpop.f32.mrf.mxu0  ;;  %v1284_v53 = vmax.f32 %v1276_v49, 0.0 }
 0x135   : > { %v1122_v47 = vpop.f32.mrf.mxu3  ;;  %v1098_v48 = vpop.f32.mrf.mxu1 }
 0x136   : > { %v1123_v50 = vadd.f32 %v1122_v47, %v1109_v44 }
 0x138   : > { %v1251_v52 = vmul.f32 %v1235_v45, %v1123_v50 }
 0x13a   : > { %v1277_v54 = vadd.f32 %v1261_v51, %v1251_v52 }
 0x13c   : > { %v1285_v55 = vmax.f32 %v1277_v54, 0.0  ;;  %v1111_v56 = vpop.f32.mrf.mxu2 }
 0x13d   : > { %v1124_v57 = vpop.f32.mrf.mxu3 }
 0x13e   : > { %v1291_v59 = vpack.c.bf16 %v1285_v55, %v1284_v53 }
 0x140   : > { %v1299_v60 = vrot.slane %v1291_v59, 6  ;;  %v1300_v61 = vrot.slane %v1291_v59, 1 }
 0x142   : > { %v1312_v63 = vsel %vm1309_vm1, %v1299_v60, %v1300_v61 }
 0x143   : > { %v1314_v0 = vsel %vm1313_vm2, %v1308_v62, %v1312_v63 }
 0x154   : > { %v1135_v2 = vpop.f32.mrf.mxu0 }
 0x155   : > { %v1148_v3 = vpop.f32.mrf.mxu1 }
 0x156   : > { %v1149_v10 = vadd.f32 %v1148_v3, %v1135_v2 }
 0x158   : > { %v1252_v14 = vmul.f32 %v1236_v11, %v1149_v10 }
 0x15a   : > { %v1278_v23 = vadd.f32 %v1262_v16, %v1252_v14 }
 0x15c   : > { %v1161_v4 = vpop.f32.mrf.mxu2  ;;  %v1137_v5 = vpop.f32.mrf.mxu0  ;;  %v1286_v30 = vmax.f32 %v1278_v23, 0.0 }
 0x15d   : > { %v1174_v1 = vpop.f32.mrf.mxu3  ;;  %v1150_v7 = vpop.f32.mrf.mxu1 }
 0x15e   : > { %v1175_v12 = vadd.f32 %v1174_v1, %v1161_v4 }
 0x160   : > { %v1253_v18 = vmul.f32 %v1237_v13, %v1175_v12 }
 0x162   : > { %v1279_v24 = vadd.f32 %v1263_v19, %v1253_v18 }
 0x164   : > { %v1163_v8 = vpop.f32.mrf.mxu2  ;;  %v1287_v33 = vmax.f32 %v1279_v24, 0.0 }
 0x165   : > { %v1176_v9 = vpop.f32.mrf.mxu3 }
 0x166   : > { %v1292_v38 = vpack.c.bf16 %v1287_v33, %v1286_v30 }
 0x168   : > { %v1301_v15 = vrot.slane %v1292_v38, 4  ;;  %v1302_v44 = vrot.slane %v1292_v38, 7 }
 0x16a   : > { %v1318_v47 = vsel %vm1315_vm3, %v1301_v15, %v1302_v44 }
 0x17c   : > { %v1187_v6 = vpop.f32.mrf.mxu0 }
 0x17d   : > { %v1200_v17 = vpop.f32.mrf.mxu1 }
 0x17e   : > { %v1201_v21 = vadd.f32 %v1200_v17, %v1187_v6 }
 0x180   : > { %v1254_v25 = vmul.f32 %v1238_v22, %v1201_v21 }
 0x182   : > { %v1280_v34 = vadd.f32 %v1264_v26, %v1254_v25 }
 0x184   : > { %v1213_v27 = vpop.f32.mrf.mxu2  ;;  %v1189_v29 = vpop.f32.mrf.mxu0  ;;  %v1288_v39 = vmax.f32 %v1280_v34, 0.0 }
 0x185   : > { %v1226_v31 = vpop.f32.mrf.mxu3  ;;  %v1202_v32 = vpop.f32.mrf.mxu1 }
 0x186   : > { %v1227_v35 = vadd.f32 %v1226_v31, %v1213_v27 }
 0x188   : > { %v1255_v37 = vmul.f32 %v1239_v28, %v1227_v35 }
 0x18a   : > { %v1281_v40 = vadd.f32 %v1265_v36, %v1255_v37 }
 0x18c   : > { %v1289_v41 = vmax.f32 %v1281_v40, 0.0  ;;  %v1215_v42 = vpop.f32.mrf.mxu2 }
 0x18d   : > { %v1228_v43 = vpop.f32.mrf.mxu3 }
 0x18e   : > { %v1293_v45 = vpack.c.bf16 %v1289_v41, %v1288_v39 }
 0x190   : > { %v1303_v20 = vrot.slane %v1293_v45, 2  ;;  %v1304_v46 = vrot.slane %v1293_v45, 5 }
 0x192   : > { %v1322_v48 = vsel %vm1319_vm4, %v1303_v20, %v1304_v46 }
 0x193   : > { %v1324_v49 = vsel %vm1323_vm5, %v1318_v47, %v1322_v48 }
 0x194   : > { %v1326_v50 = vsel %vm1325_vm6, %v1314_v0, %v1324_v49 }
 0x195   : > { %1328 = vst [vmem:[%s307_s22] sm:$0xff] %v1326_v50 }
 0x196   : > { %1710 = shalt.err (!%p1707_p5)
}
 0x197   : > { %1502 = dma.vmem_to_hbm [thread:$0]  (%p1873_p11), %s1343_s10, 128, %s1345_s25, %s1330_s14  }
 0x198 PF: > { %s1356_s12 = sand.u32 1, %s1745_s15   ;;  %p2105_p7 = scmp.ge.s32.totalorder %s1757_s18, 2 }
 0x199   : > { %s1357_s7 = scalar_lea.sflag [#allocation4], %s1356_s12 }
 0x19a   : > { %p1519_p10 = pnand %p2105_p7, %p1877_p12 }
 0x19c   : > { %p1520_p13 = pneg %p1519_p10 }
 0x19e   : > { %1740 = dma.done.wait (%p1520_p13), %s1357_s7, 128  }
 0x19f   : > { %1742 = vsyncadd (%p1520_p13), %s1357_s7, 4294967168  ;;  %s2106_s9 = sld [smem:[#allocation15_spill]]  ;;  %p21_p0 = scmp.ge.s32.totalorder %s1808_s19, 4  }
 0x1a0   : > { %s2107_s15 = smov %s1749_s16  ;;  %s2108_s16 = smov %s1753_s17 }
 0x1a1   : > { %s2110_s18 = smov %s1808_s19  ;;  %23 = sbr.rel (!%p21_p0) target bundleno = 11 (0xb), region = 110 }
 0x1a5   : > { %s2109_s17 = smov %s2106_s9 }
 0x1a6   :  { %1363 = vsyncpa [#allocation3], 1 }
 0x1a7   :  { %1365 = vsyncpa [#allocation3 + $0x1], 1 }
 0x1a8   :  { %1366 = vsyncpa [#allocation6], 1 }
 0x1a9   :  { %1368 = vsyncpa [#allocation6 + $0x1], 1 }
 0x1aa   :  { %1369 = vsyncpa [#allocation9], 1 }
 0x1ab   :  { %1371 = vsyncpa [#allocation9 + $0x1], 1 }
 0x1ac   :  { %1372 = vsyncpa [#allocation4], 1 }
 0x1ad   :  { %1374 = vsyncpa [#allocation4 + $0x1], 1 }

</bundles_post_ra>
